<compile_context>
chip_gen: v7x
topology: tpu7x:2x2x1
jax: 0.10.0
libtpu: 0.0.40
codegen_flags: <defaults>
</compile_context>

<pallas_src>
import math

import jax
import jax.numpy as jnp
from jax.experimental import pallas as pl
from jax.experimental.pallas import tpu as pltpu

# ----------------------------- config ---------------------------------------
D_MODEL = 32
N_HEADS = 4
D_K = D_MODEL // N_HEADS
D_FF = 64
EPS = 1e-6
NEG_INF = -1e9
SCALE = 1.0 / math.sqrt(D_K)


# --------------------------- fused layer kernel ------------------------------
def _decoder_layer_kernel(
    # activations / masks
    x_ref, mem_ref, tgt_bias_ref, src_bias_ref,
    # sublayer 0: self-attention
    ln1_g_ref, ln1_b_ref, wqkv_s_ref, bqkv_s_ref, wo_s_ref, bo_s_ref,
    # sublayer 1: source (cross) attention
    ln2_g_ref, ln2_b_ref, wq_c_ref, bq_c_ref, wkv_c_ref, bkv_c_ref,
    wo_c_ref, bo_c_ref,
    # sublayer 2: feed-forward
    ln3_g_ref, ln3_b_ref, ff_w1_ref, ff_b1_ref, ff_w2_ref, ff_b2_ref,
    # output
    o_ref,
):
    B, St, D = x_ref.shape
    Ss = mem_ref.shape[1]

    # Residual stream kept flat (rows = B*S, lanes = d_model); the (B,S,D) <->
    # (B*S,D) reshapes only collapse/expand leading dims (minor dim unchanged),
    # so they are free layout views.
    x = x_ref[...].reshape(B * St, D)
    mem = mem_ref[...].reshape(B * Ss, D)

    def layer_norm(v, g, b):
        # Annotated-Transformer LayerNorm: a2*(x-mean)/(std+eps)+b2 with
        # torch's default unbiased std (ddof = 1).
        mean = jnp.mean(v, axis=-1, keepdims=True)
        var = jnp.sum((v - mean) ** 2, axis=-1, keepdims=True) / (D - 1)
        inv = pl.reciprocal(jnp.sqrt(var) + EPS, approx=True)   # EUP, not VALU
        return g * (v - mean) * inv + b

    def attention(q2, k2, v2, bias, Sq, Skv):
        # q2: (B*Sq, D), k2/v2: (B*Skv, D), bias: (B, 1|Sq, Skv) additive mask.
        heads = []
        for h in range(N_HEADS):                       # static unroll, H = 4
            cs = slice(h * D_K, (h + 1) * D_K)
            qh = q2[:, cs].reshape(B, Sq, D_K)
            kh = k2[:, cs].reshape(B, Skv, D_K)
            vh = v2[:, cs].reshape(B, Skv, D_K)
            s = jnp.einsum("bqd,bkd->bqk", qh, kh,
                           preferred_element_type=jnp.float32) * SCALE
            s = s + bias                               # masked scores -> ~-1e9
            s = s - jnp.max(s, axis=-1, keepdims=True)
            p = jnp.exp(s)
            p = p * pl.reciprocal(jnp.sum(p, axis=-1, keepdims=True),
                                  approx=True)
            heads.append(
                jnp.einsum("bqk,bkd->bqd", p, vh,
                           preferred_element_type=jnp.float32)
                .reshape(B * Sq, D_K))
        return heads

    def out_proj(heads, wo, bo):
        # concat(heads, -1) @ wo + bo  ==  sum_h heads[h] @ wo[h*dk:(h+1)*dk]
        acc = jnp.dot(heads[0], wo[0:D_K, :],
                      preferred_element_type=jnp.float32)
        for h in range(1, N_HEADS):
            acc = acc + jnp.dot(heads[h], wo[h * D_K:(h + 1) * D_K, :],
                                preferred_element_type=jnp.float32)
        return acc + bo

    # ---- sublayer 0: x = x + self_attn(LN1(x), LN1(x), LN1(x), tgt_mask) ----
    xn = layer_norm(x, ln1_g_ref[...], ln1_b_ref[...])
    qkv = jnp.dot(xn, wqkv_s_ref[...],
                  preferred_element_type=jnp.float32) + bqkv_s_ref[...]
    heads = attention(qkv[:, 0:D], qkv[:, D:2 * D], qkv[:, 2 * D:3 * D],
                      tgt_bias_ref[...], St, St)
    x = x + out_proj(heads, wo_s_ref[...], bo_s_ref[...])

    # ---- sublayer 1: x = x + src_attn(LN2(x), memory, memory, src_mask) ----
    xn = layer_norm(x, ln2_g_ref[...], ln2_b_ref[...])
    q_c = jnp.dot(xn, wq_c_ref[...],
                  preferred_element_type=jnp.float32) + bq_c_ref[...]
    kv_c = jnp.dot(mem, wkv_c_ref[...],
                   preferred_element_type=jnp.float32) + bkv_c_ref[...]
    heads = attention(q_c, kv_c[:, 0:D], kv_c[:, D:2 * D],
                      src_bias_ref[...], St, Ss)
    x = x + out_proj(heads, wo_c_ref[...], bo_c_ref[...])

    # ---- sublayer 2: x = x + FFN(LN3(x)) ----
    # TODO(synk): dropout inside SublayerConnection / FFN is identity (eval mode).
    xn = layer_norm(x, ln3_g_ref[...], ln3_b_ref[...])
    hdn = jnp.maximum(
        jnp.dot(xn, ff_w1_ref[...], preferred_element_type=jnp.float32)
        + ff_b1_ref[...], 0.0)
    x = x + jnp.dot(hdn, ff_w2_ref[...],
                    preferred_element_type=jnp.float32) + ff_b2_ref[...]

    o_ref[...] = x.reshape(B, St, D).astype(o_ref.dtype)


# ------------------------------ wrapper --------------------------------------
@jax.jit
def decoder_layer_forward(params, x, memory, src_mask, tgt_mask):
    """DecoderLayer.forward(x, memory, src_mask, tgt_mask) as ONE fused kernel."""
    B, St, D = x.shape
    Ss = memory.shape[1]

    sa, ca, ff, ln = (params["self_attn"], params["src_attn"],
                      params["ff"], params["ln"])

    # Fused projection weights (trace-time concat, done once per jit).
    w_qkv_s = jnp.concatenate([sa["wq"], sa["wk"], sa["wv"]], axis=1)   # (D,3D)
    b_qkv_s = jnp.concatenate([sa["bq"], sa["bk"], sa["bv"]]).reshape(1, 3 * D)
    w_kv_c = jnp.concatenate([ca["wk"], ca["wv"]], axis=1)              # (D,2D)
    b_kv_c = jnp.concatenate([ca["bk"], ca["bv"]]).reshape(1, 2 * D)

    # Additive attention bias: 0 where mask==1, -1e9 where mask==0
    # (same softmax result as masked_fill(mask == 0, -1e9)).
    tgt_bias = jnp.where(tgt_mask == 0, NEG_INF, 0.0).astype(jnp.float32)
    src_bias = jnp.where(src_mask == 0, NEG_INF, 0.0).astype(jnp.float32)

    args = (
        x, memory, tgt_bias, src_bias,
        ln[0]["g"].reshape(1, D), ln[0]["b"].reshape(1, D),
        w_qkv_s, b_qkv_s, sa["wo"], sa["bo"].reshape(1, D),
        ln[1]["g"].reshape(1, D), ln[1]["b"].reshape(1, D),
        ca["wq"], ca["bq"].reshape(1, D), w_kv_c, b_kv_c,
        ca["wo"], ca["bo"].reshape(1, D),
        ln[2]["g"].reshape(1, D), ln[2]["b"].reshape(1, D),
        ff["w1"], ff["b1"].reshape(1, D_FF), ff["w2"], ff["b2"].reshape(1, D),
    )

    vmem = pl.BlockSpec(memory_space=pltpu.MemorySpace.VMEM)  # whole-array VMEM
    return pl.pallas_call(
        _decoder_layer_kernel,
        out_shape=jax.ShapeDtypeStruct((B, St, D), jnp.float32),
        in_specs=[vmem] * len(args),
        out_specs=vmem,
    )(*args)


# --------------------------- parameter init ----------------------------------
def init_params(key):
    keys = iter(jax.random.split(key, 64))

    def nrm(shape, scale=0.05):
        return scale * jax.random.normal(next(keys), shape, dtype=jnp.float32)

    def zeros(s):
        return jnp.zeros(s, jnp.float32)

    def ones(s):
        return jnp.ones(s, jnp.float32)

    def attn():
        return {"wq": nrm((D_MODEL, D_MODEL)), "bq": nrm((D_MODEL,), 0.02),
                "wk": nrm((D_MODEL, D_MODEL)), "bk": nrm((D_MODEL,), 0.02),
                "wv": nrm((D_MODEL, D_MODEL)), "bv": nrm((D_MODEL,), 0.02),
                "wo": nrm((D_MODEL, D_MODEL)), "bo": nrm((D_MODEL,), 0.02)}

    return {
        "ln": [{"g": ones((D_MODEL,)), "b": zeros((D_MODEL,))}
               for _ in range(3)],
        "self_attn": attn(),
        "src_attn": attn(),
        "ff": {"w1": nrm((D_MODEL, D_FF)), "b1": nrm((D_FF,), 0.02),
               "w2": nrm((D_FF, D_MODEL)), "b2": nrm((D_MODEL,), 0.02)},
    }


# --------------------------------- main ---------------------------------------
if __name__ == "__main__":
    key = jax.random.PRNGKey(0)
    pkey, xkey, mkey = jax.random.split(key, 3)

    params = init_params(pkey)

    B, S_TGT, S_SRC = 2, 8, 8
    x = jax.random.normal(xkey, (B, S_TGT, D_MODEL), dtype=jnp.float32)
    memory = jax.random.normal(mkey, (B, S_SRC, D_MODEL), dtype=jnp.float32)
    src_mask = jnp.ones((B, 1, S_SRC), dtype=jnp.int32)                 # (B,1,Ss)
    tgt_mask = jnp.broadcast_to(
        jnp.tril(jnp.ones((S_TGT, S_TGT), dtype=jnp.int32))[None],
        (B, S_TGT, S_TGT))                                              # causal

    out = decoder_layer_forward(params, x, memory, src_mask, tgt_mask)
    out = jax.block_until_ready(out)

    assert out.shape == (B, S_TGT, D_MODEL)
    assert out.dtype == jnp.float32
    assert bool(jnp.all(jnp.isfinite(out)))
    print("KERNEL_OK")
</pallas_src>

<mosaic_0001>
module attributes {stable_mosaic.version = 11 : i64} {
  func.func @_decoder_layer_kernel(%arg0: memref<2x8x32xf32, #tpu.memory_space<vmem>>, %arg1: memref<2x8x32xf32, #tpu.memory_space<vmem>>, %arg2: memref<2x8x8xf32, #tpu.memory_space<vmem>>, %arg3: memref<2x1x8xf32, #tpu.memory_space<vmem>>, %arg4: memref<1x32xf32, #tpu.memory_space<vmem>>, %arg5: memref<1x32xf32, #tpu.memory_space<vmem>>, %arg6: memref<32x96xf32, #tpu.memory_space<vmem>>, %arg7: memref<1x96xf32, #tpu.memory_space<vmem>>, %arg8: memref<32x32xf32, #tpu.memory_space<vmem>>, %arg9: memref<1x32xf32, #tpu.memory_space<vmem>>, %arg10: memref<1x32xf32, #tpu.memory_space<vmem>>, %arg11: memref<1x32xf32, #tpu.memory_space<vmem>>, %arg12: memref<32x32xf32, #tpu.memory_space<vmem>>, %arg13: memref<1x32xf32, #tpu.memory_space<vmem>>, %arg14: memref<32x64xf32, #tpu.memory_space<vmem>>, %arg15: memref<1x64xf32, #tpu.memory_space<vmem>>, %arg16: memref<32x32xf32, #tpu.memory_space<vmem>>, %arg17: memref<1x32xf32, #tpu.memory_space<vmem>>, %arg18: memref<1x32xf32, #tpu.memory_space<vmem>>, %arg19: memref<1x32xf32, #tpu.memory_space<vmem>>, %arg20: memref<32x64xf32, #tpu.memory_space<vmem>>, %arg21: memref<1x64xf32, #tpu.memory_space<vmem>>, %arg22: memref<64x32xf32, #tpu.memory_space<vmem>>, %arg23: memref<1x32xf32, #tpu.memory_space<vmem>>, %arg24: memref<2x8x32xf32, #tpu.memory_space<vmem>>) attributes {dimension_semantics = [], scalar_prefetch = 0 : i64, scratch_operands = 0 : i64, tpu.core_type = #tpu.core_type<tc>} {
    %c0 = arith.constant 0 : index
    %c0_0 = arith.constant 0 : index
    %c0_1 = arith.constant 0 : index
    %0 = vector.load %arg0[%c0, %c0_0, %c0_1] : memref<2x8x32xf32, #tpu.memory_space<vmem>>, vector<2x8x32xf32>
    %1 = vector.shape_cast %0 : vector<2x8x32xf32> to vector<16x32xf32>
    %c0_2 = arith.constant 0 : index
    %c0_3 = arith.constant 0 : index
    %c0_4 = arith.constant 0 : index
    %2 = vector.load %arg1[%c0_2, %c0_3, %c0_4] : memref<2x8x32xf32, #tpu.memory_space<vmem>>, vector<2x8x32xf32>
    %3 = vector.shape_cast %2 : vector<2x8x32xf32> to vector<16x32xf32>
    %c0_5 = arith.constant 0 : index
    %c0_6 = arith.constant 0 : index
    %4 = vector.load %arg4[%c0_5, %c0_6] : memref<1x32xf32, #tpu.memory_space<vmem>>, vector<1x32xf32>
    %c0_7 = arith.constant 0 : index
    %c0_8 = arith.constant 0 : index
    %5 = vector.load %arg5[%c0_7, %c0_8] : memref<1x32xf32, #tpu.memory_space<vmem>>, vector<1x32xf32>
    %cst = arith.constant dense<0.000000e+00> : vector<16xf32>
    %6 = vector.multi_reduction <add>, %1, %cst [1] : vector<16x32xf32> to vector<16xf32>
    %7 = vector.shape_cast %6 : vector<16xf32> to vector<16x1xf32>
    %cst_9 = arith.constant 3.200000e+01 : f32
    %8 = vector.broadcast %cst_9 : f32 to vector<16x1xf32>
    %9 = arith.divf %7, %8 : vector<16x1xf32>
    %10 = vector.broadcast %9 : vector<16x1xf32> to vector<16x32xf32>
    %11 = arith.subf %1, %10 : vector<16x32xf32>
    %12 = arith.mulf %11, %11 : vector<16x32xf32>
    %cst_10 = arith.constant dense<0.000000e+00> : vector<16xf32>
    %13 = vector.multi_reduction <add>, %12, %cst_10 [1] : vector<16x32xf32> to vector<16xf32>
    %14 = vector.shape_cast %13 : vector<16xf32> to vector<16x1xf32>
    %cst_11 = arith.constant 3.100000e+01 : f32
    %15 = vector.broadcast %cst_11 : f32 to vector<16x1xf32>
    %16 = arith.divf %14, %15 : vector<16x1xf32>
    %17 = math.sqrt %16 : vector<16x1xf32>
    %cst_12 = arith.constant 9.99999997E-7 : f32
    %18 = vector.broadcast %cst_12 : f32 to vector<16x1xf32>
    %19 = arith.addf %17, %18 : vector<16x1xf32>
    %20 = tpu.reciprocal %19 {approx = true} : vector<16x1xf32> -> vector<16x1xf32>
    %21 = vector.broadcast %9 : vector<16x1xf32> to vector<16x32xf32>
    %22 = arith.subf %1, %21 : vector<16x32xf32>
    %23 = vector.broadcast %4 : vector<1x32xf32> to vector<16x32xf32>
    %24 = arith.mulf %23, %22 : vector<16x32xf32>
    %25 = vector.broadcast %20 : vector<16x1xf32> to vector<16x32xf32>
    %26 = arith.mulf %24, %25 : vector<16x32xf32>
    %27 = vector.broadcast %5 : vector<1x32xf32> to vector<16x32xf32>
    %28 = arith.addf %26, %27 : vector<16x32xf32>
    %c0_13 = arith.constant 0 : index
    %c0_14 = arith.constant 0 : index
    %29 = vector.load %arg6[%c0_13, %c0_14] : memref<32x96xf32, #tpu.memory_space<vmem>>, vector<32x96xf32>
    %cst_15 = arith.constant dense<0.000000e+00> : vector<16x96xf32>
    %30 = tpu.matmul %28, %29, %cst_15 {dimension_numbers = #tpu.dot_dimension_numbers<[1], [0], [0], [1], [0, 0, 1, 1], [], []>} : vector<16x32xf32>, vector<32x96xf32>, vector<16x96xf32> -> vector<16x96xf32>
    %c0_16 = arith.constant 0 : index
    %c0_17 = arith.constant 0 : index
    %31 = vector.load %arg7[%c0_16, %c0_17] : memref<1x96xf32, #tpu.memory_space<vmem>>, vector<1x96xf32>
    %32 = vector.broadcast %31 : vector<1x96xf32> to vector<16x96xf32>
    %33 = arith.addf %30, %32 : vector<16x96xf32>
    %34 = vector.extract_strided_slice %33 {offsets = [0, 0], sizes = [16, 32], strides = [1, 1]} : vector<16x96xf32> to vector<16x32xf32>
    %35 = vector.extract_strided_slice %33 {offsets = [0, 32], sizes = [16, 32], strides = [1, 1]} : vector<16x96xf32> to vector<16x32xf32>
    %36 = vector.extract_strided_slice %33 {offsets = [0, 64], sizes = [16, 32], strides = [1, 1]} : vector<16x96xf32> to vector<16x32xf32>
    %c0_18 = arith.constant 0 : index
    %c0_19 = arith.constant 0 : index
    %c0_20 = arith.constant 0 : index
    %37 = vector.load %arg2[%c0_18, %c0_19, %c0_20] : memref<2x8x8xf32, #tpu.memory_space<vmem>>, vector<2x8x8xf32>
    %38 = vector.extract_strided_slice %34 {offsets = [0, 0], sizes = [16, 8], strides = [1, 1]} : vector<16x32xf32> to vector<16x8xf32>
    %39 = vector.shape_cast %38 : vector<16x8xf32> to vector<2x8x8xf32>
    %40 = vector.extract_strided_slice %35 {offsets = [0, 0], sizes = [16, 8], strides = [1, 1]} : vector<16x32xf32> to vector<16x8xf32>
    %41 = vector.shape_cast %40 : vector<16x8xf32> to vector<2x8x8xf32>
    %42 = vector.extract_strided_slice %36 {offsets = [0, 0], sizes = [16, 8], strides = [1, 1]} : vector<16x32xf32> to vector<16x8xf32>
    %43 = vector.shape_cast %42 : vector<16x8xf32> to vector<2x8x8xf32>
    "tpu.trace_start"() <{level = 10 : i32, message = "bqd,bkd->bqk"}> : () -> ()
    %cst_21 = arith.constant dense<0.000000e+00> : vector<2x8x8xf32>
    %44 = tpu.matmul %39, %41, %cst_21 {dimension_numbers = #tpu.dot_dimension_numbers<[2], [2], [1], [1], [0, 0, 0, 1, 1, 1], [0], [0]>} : vector<2x8x8xf32>, vector<2x8x8xf32>, vector<2x8x8xf32> -> vector<2x8x8xf32>
    "tpu.trace_stop"() : () -> ()
    %cst_22 = arith.constant 0.353553385 : f32
    %45 = vector.broadcast %cst_22 : f32 to vector<2x8x8xf32>
    %46 = arith.mulf %44, %45 : vector<2x8x8xf32>
    %47 = arith.addf %46, %37 : vector<2x8x8xf32>
    %cst_23 = arith.constant dense<0xFF800000> : vector<2x8xf32>
    %48 = vector.multi_reduction <maximumf>, %47, %cst_23 [2] : vector<2x8x8xf32> to vector<2x8xf32>
    %49 = vector.shape_cast %48 : vector<2x8xf32> to vector<2x8x1xf32>
    %50 = vector.broadcast %49 : vector<2x8x1xf32> to vector<2x8x8xf32>
    %51 = arith.subf %47, %50 : vector<2x8x8xf32>
    %52 = math.exp %51 : vector<2x8x8xf32>
    %cst_24 = arith.constant dense<0.000000e+00> : vector<2x8xf32>
    %53 = vector.multi_reduction <add>, %52, %cst_24 [2] : vector<2x8x8xf32> to vector<2x8xf32>
    %54 = vector.shape_cast %53 : vector<2x8xf32> to vector<2x8x1xf32>
    %55 = tpu.reciprocal %54 {approx = true} : vector<2x8x1xf32> -> vector<2x8x1xf32>
    %56 = vector.broadcast %55 : vector<2x8x1xf32> to vector<2x8x8xf32>
    %57 = arith.mulf %52, %56 : vector<2x8x8xf32>
    "tpu.trace_start"() <{level = 10 : i32, message = "bqk,bkd->bqd"}> : () -> ()
    %cst_25 = arith.constant dense<0.000000e+00> : vector<2x8x8xf32>
    %58 = tpu.matmul %57, %43, %cst_25 {dimension_numbers = #tpu.dot_dimension_numbers<[2], [1], [1], [2], [0, 0, 0, 1, 1, 2], [0], [0]>} : vector<2x8x8xf32>, vector<2x8x8xf32>, vector<2x8x8xf32> -> vector<2x8x8xf32>
    "tpu.trace_stop"() : () -> ()
    %59 = vector.shape_cast %58 : vector<2x8x8xf32> to vector<16x8xf32>
    %60 = vector.extract_strided_slice %34 {offsets = [0, 8], sizes = [16, 8], strides = [1, 1]} : vector<16x32xf32> to vector<16x8xf32>
    %61 = vector.shape_cast %60 : vector<16x8xf32> to vector<2x8x8xf32>
    %62 = vector.extract_strided_slice %35 {offsets = [0, 8], sizes = [16, 8], strides = [1, 1]} : vector<16x32xf32> to vector<16x8xf32>
    %63 = vector.shape_cast %62 : vector<16x8xf32> to vector<2x8x8xf32>
    %64 = vector.extract_strided_slice %36 {offsets = [0, 8], sizes = [16, 8], strides = [1, 1]} : vector<16x32xf32> to vector<16x8xf32>
    %65 = vector.shape_cast %64 : vector<16x8xf32> to vector<2x8x8xf32>
    "tpu.trace_start"() <{level = 10 : i32, message = "bqd,bkd->bqk"}> : () -> ()
    %cst_26 = arith.constant dense<0.000000e+00> : vector<2x8x8xf32>
    %66 = tpu.matmul %61, %63, %cst_26 {dimension_numbers = #tpu.dot_dimension_numbers<[2], [2], [1], [1], [0, 0, 0, 1, 1, 1], [0], [0]>} : vector<2x8x8xf32>, vector<2x8x8xf32>, vector<2x8x8xf32> -> vector<2x8x8xf32>
    "tpu.trace_stop"() : () -> ()
    %cst_27 = arith.constant 0.353553385 : f32
    %67 = vector.broadcast %cst_27 : f32 to vector<2x8x8xf32>
    %68 = arith.mulf %66, %67 : vector<2x8x8xf32>
    %69 = arith.addf %68, %37 : vector<2x8x8xf32>
    %cst_28 = arith.constant dense<0xFF800000> : vector<2x8xf32>
    %70 = vector.multi_reduction <maximumf>, %69, %cst_28 [2] : vector<2x8x8xf32> to vector<2x8xf32>
    %71 = vector.shape_cast %70 : vector<2x8xf32> to vector<2x8x1xf32>
    %72 = vector.broadcast %71 : vector<2x8x1xf32> to vector<2x8x8xf32>
    %73 = arith.subf %69, %72 : vector<2x8x8xf32>
    %74 = math.exp %73 : vector<2x8x8xf32>
    %cst_29 = arith.constant dense<0.000000e+00> : vector<2x8xf32>
    %75 = vector.multi_reduction <add>, %74, %cst_29 [2] : vector<2x8x8xf32> to vector<2x8xf32>
    %76 = vector.shape_cast %75 : vector<2x8xf32> to vector<2x8x1xf32>
    %77 = tpu.reciprocal %76 {approx = true} : vector<2x8x1xf32> -> vector<2x8x1xf32>
    %78 = vector.broadcast %77 : vector<2x8x1xf32> to vector<2x8x8xf32>
    %79 = arith.mulf %74, %78 : vector<2x8x8xf32>
    "tpu.trace_start"() <{level = 10 : i32, message = "bqk,bkd->bqd"}> : () -> ()
    %cst_30 = arith.constant dense<0.000000e+00> : vector<2x8x8xf32>
    %80 = tpu.matmul %79, %65, %cst_30 {dimension_numbers = #tpu.dot_dimension_numbers<[2], [1], [1], [2], [0, 0, 0, 1, 1, 2], [0], [0]>} : vector<2x8x8xf32>, vector<2x8x8xf32>, vector<2x8x8xf32> -> vector<2x8x8xf32>
    "tpu.trace_stop"() : () -> ()
    %81 = vector.shape_cast %80 : vector<2x8x8xf32> to vector<16x8xf32>
    %82 = vector.extract_strided_slice %34 {offsets = [0, 16], sizes = [16, 8], strides = [1, 1]} : vector<16x32xf32> to vector<16x8xf32>
    %83 = vector.shape_cast %82 : vector<16x8xf32> to vector<2x8x8xf32>
    %84 = vector.extract_strided_slice %35 {offsets = [0, 16], sizes = [16, 8], strides = [1, 1]} : vector<16x32xf32> to vector<16x8xf32>
    %85 = vector.shape_cast %84 : vector<16x8xf32> to vector<2x8x8xf32>
    %86 = vector.extract_strided_slice %36 {offsets = [0, 16], sizes = [16, 8], strides = [1, 1]} : vector<16x32xf32> to vector<16x8xf32>
    %87 = vector.shape_cast %86 : vector<16x8xf32> to vector<2x8x8xf32>
    "tpu.trace_start"() <{level = 10 : i32, message = "bqd,bkd->bqk"}> : () -> ()
    %cst_31 = arith.constant dense<0.000000e+00> : vector<2x8x8xf32>
    %88 = tpu.matmul %83, %85, %cst_31 {dimension_numbers = #tpu.dot_dimension_numbers<[2], [2], [1], [1], [0, 0, 0, 1, 1, 1], [0], [0]>} : vector<2x8x8xf32>, vector<2x8x8xf32>, vector<2x8x8xf32> -> vector<2x8x8xf32>
    "tpu.trace_stop"() : () -> ()
    %cst_32 = arith.constant 0.353553385 : f32
    %89 = vector.broadcast %cst_32 : f32 to vector<2x8x8xf32>
    %90 = arith.mulf %88, %89 : vector<2x8x8xf32>
    %91 = arith.addf %90, %37 : vector<2x8x8xf32>
    %cst_33 = arith.constant dense<0xFF800000> : vector<2x8xf32>
    %92 = vector.multi_reduction <maximumf>, %91, %cst_33 [2] : vector<2x8x8xf32> to vector<2x8xf32>
    %93 = vector.shape_cast %92 : vector<2x8xf32> to vector<2x8x1xf32>
    %94 = vector.broadcast %93 : vector<2x8x1xf32> to vector<2x8x8xf32>
    %95 = arith.subf %91, %94 : vector<2x8x8xf32>
    %96 = math.exp %95 : vector<2x8x8xf32>
    %cst_34 = arith.constant dense<0.000000e+00> : vector<2x8xf32>
    %97 = vector.multi_reduction <add>, %96, %cst_34 [2] : vector<2x8x8xf32> to vector<2x8xf32>
    %98 = vector.shape_cast %97 : vector<2x8xf32> to vector<2x8x1xf32>
    %99 = tpu.reciprocal %98 {approx = true} : vector<2x8x1xf32> -> vector<2x8x1xf32>
    %100 = vector.broadcast %99 : vector<2x8x1xf32> to vector<2x8x8xf32>
    %101 = arith.mulf %96, %100 : vector<2x8x8xf32>
    "tpu.trace_start"() <{level = 10 : i32, message = "bqk,bkd->bqd"}> : () -> ()
    %cst_35 = arith.constant dense<0.000000e+00> : vector<2x8x8xf32>
    %102 = tpu.matmul %101, %87, %cst_35 {dimension_numbers = #tpu.dot_dimension_numbers<[2], [1], [1], [2], [0, 0, 0, 1, 1, 2], [0], [0]>} : vector<2x8x8xf32>, vector<2x8x8xf32>, vector<2x8x8xf32> -> vector<2x8x8xf32>
    "tpu.trace_stop"() : () -> ()
    %103 = vector.shape_cast %102 : vector<2x8x8xf32> to vector<16x8xf32>
    %104 = vector.extract_strided_slice %34 {offsets = [0, 24], sizes = [16, 8], strides = [1, 1]} : vector<16x32xf32> to vector<16x8xf32>
    %105 = vector.shape_cast %104 : vector<16x8xf32> to vector<2x8x8xf32>
    %106 = vector.extract_strided_slice %35 {offsets = [0, 24], sizes = [16, 8], strides = [1, 1]} : vector<16x32xf32> to vector<16x8xf32>
    %107 = vector.shape_cast %106 : vector<16x8xf32> to vector<2x8x8xf32>
    %108 = vector.extract_strided_slice %36 {offsets = [0, 24], sizes = [16, 8], strides = [1, 1]} : vector<16x32xf32> to vector<16x8xf32>
    %109 = vector.shape_cast %108 : vector<16x8xf32> to vector<2x8x8xf32>
    "tpu.trace_start"() <{level = 10 : i32, message = "bqd,bkd->bqk"}> : () -> ()
    %cst_36 = arith.constant dense<0.000000e+00> : vector<2x8x8xf32>
    %110 = tpu.matmul %105, %107, %cst_36 {dimension_numbers = #tpu.dot_dimension_numbers<[2], [2], [1], [1], [0, 0, 0, 1, 1, 1], [0], [0]>} : vector<2x8x8xf32>, vector<2x8x8xf32>, vector<2x8x8xf32> -> vector<2x8x8xf32>
    "tpu.trace_stop"() : () -> ()
    %cst_37 = arith.constant 0.353553385 : f32
    %111 = vector.broadcast %cst_37 : f32 to vector<2x8x8xf32>
    %112 = arith.mulf %110, %111 : vector<2x8x8xf32>
    %113 = arith.addf %112, %37 : vector<2x8x8xf32>
    %cst_38 = arith.constant dense<0xFF800000> : vector<2x8xf32>
    %114 = vector.multi_reduction <maximumf>, %113, %cst_38 [2] : vector<2x8x8xf32> to vector<2x8xf32>
    %115 = vector.shape_cast %114 : vector<2x8xf32> to vector<2x8x1xf32>
    %116 = vector.broadcast %115 : vector<2x8x1xf32> to vector<2x8x8xf32>
    %117 = arith.subf %113, %116 : vector<2x8x8xf32>
    %118 = math.exp %117 : vector<2x8x8xf32>
    %cst_39 = arith.constant dense<0.000000e+00> : vector<2x8xf32>
    %119 = vector.multi_reduction <add>, %118, %cst_39 [2] : vector<2x8x8xf32> to vector<2x8xf32>
    %120 = vector.shape_cast %119 : vector<2x8xf32> to vector<2x8x1xf32>
    %121 = tpu.reciprocal %120 {approx = true} : vector<2x8x1xf32> -> vector<2x8x1xf32>
    %122 = vector.broadcast %121 : vector<2x8x1xf32> to vector<2x8x8xf32>
    %123 = arith.mulf %118, %122 : vector<2x8x8xf32>
    "tpu.trace_start"() <{level = 10 : i32, message = "bqk,bkd->bqd"}> : () -> ()
    %cst_40 = arith.constant dense<0.000000e+00> : vector<2x8x8xf32>
    %124 = tpu.matmul %123, %109, %cst_40 {dimension_numbers = #tpu.dot_dimension_numbers<[2], [1], [1], [2], [0, 0, 0, 1, 1, 2], [0], [0]>} : vector<2x8x8xf32>, vector<2x8x8xf32>, vector<2x8x8xf32> -> vector<2x8x8xf32>
    "tpu.trace_stop"() : () -> ()
    %125 = vector.shape_cast %124 : vector<2x8x8xf32> to vector<16x8xf32>
    %c0_41 = arith.constant 0 : index
    %c0_42 = arith.constant 0 : index
    %126 = vector.load %arg8[%c0_41, %c0_42] : memref<32x32xf32, #tpu.memory_space<vmem>>, vector<32x32xf32>
    %c0_43 = arith.constant 0 : index
    %c0_44 = arith.constant 0 : index
    %127 = vector.load %arg9[%c0_43, %c0_44] : memref<1x32xf32, #tpu.memory_space<vmem>>, vector<1x32xf32>
    %128 = vector.extract_strided_slice %126 {offsets = [0, 0], sizes = [8, 32], strides = [1, 1]} : vector<32x32xf32> to vector<8x32xf32>
    %cst_45 = arith.constant dense<0.000000e+00> : vector<16x32xf32>
    %129 = tpu.matmul %59, %128, %cst_45 {dimension_numbers = #tpu.dot_dimension_numbers<[1], [0], [0], [1], [0, 0, 1, 1], [], []>} : vector<16x8xf32>, vector<8x32xf32>, vector<16x32xf32> -> vector<16x32xf32>
    %130 = vector.extract_strided_slice %126 {offsets = [8, 0], sizes = [8, 32], strides = [1, 1]} : vector<32x32xf32> to vector<8x32xf32>
    %cst_46 = arith.constant dense<0.000000e+00> : vector<16x32xf32>
    %131 = tpu.matmul %81, %130, %cst_46 {dimension_numbers = #tpu.dot_dimension_numbers<[1], [0], [0], [1], [0, 0, 1, 1], [], []>} : vector<16x8xf32>, vector<8x32xf32>, vector<16x32xf32> -> vector<16x32xf32>
    %132 = arith.addf %129, %131 : vector<16x32xf32>
    %133 = vector.extract_strided_slice %126 {offsets = [16, 0], sizes = [8, 32], strides = [1, 1]} : vector<32x32xf32> to vector<8x32xf32>
    %cst_47 = arith.constant dense<0.000000e+00> : vector<16x32xf32>
    %134 = tpu.matmul %103, %133, %cst_47 {dimension_numbers = #tpu.dot_dimension_numbers<[1], [0], [0], [1], [0, 0, 1, 1], [], []>} : vector<16x8xf32>, vector<8x32xf32>, vector<16x32xf32> -> vector<16x32xf32>
    %135 = arith.addf %132, %134 : vector<16x32xf32>
    %136 = vector.extract_strided_slice %126 {offsets = [24, 0], sizes = [8, 32], strides = [1, 1]} : vector<32x32xf32> to vector<8x32xf32>
    %cst_48 = arith.constant dense<0.000000e+00> : vector<16x32xf32>
    %137 = tpu.matmul %125, %136, %cst_48 {dimension_numbers = #tpu.dot_dimension_numbers<[1], [0], [0], [1], [0, 0, 1, 1], [], []>} : vector<16x8xf32>, vector<8x32xf32>, vector<16x32xf32> -> vector<16x32xf32>
    %138 = arith.addf %135, %137 : vector<16x32xf32>
    %139 = vector.broadcast %127 : vector<1x32xf32> to vector<16x32xf32>
    %140 = arith.addf %138, %139 : vector<16x32xf32>
    %141 = arith.addf %1, %140 : vector<16x32xf32>
    %c0_49 = arith.constant 0 : index
    %c0_50 = arith.constant 0 : index
    %142 = vector.load %arg10[%c0_49, %c0_50] : memref<1x32xf32, #tpu.memory_space<vmem>>, vector<1x32xf32>
    %c0_51 = arith.constant 0 : index
    %c0_52 = arith.constant 0 : index
    %143 = vector.load %arg11[%c0_51, %c0_52] : memref<1x32xf32, #tpu.memory_space<vmem>>, vector<1x32xf32>
    %cst_53 = arith.constant dense<0.000000e+00> : vector<16xf32>
    %144 = vector.multi_reduction <add>, %141, %cst_53 [1] : vector<16x32xf32> to vector<16xf32>
    %145 = vector.shape_cast %144 : vector<16xf32> to vector<16x1xf32>
    %cst_54 = arith.constant 3.200000e+01 : f32
    %146 = vector.broadcast %cst_54 : f32 to vector<16x1xf32>
    %147 = arith.divf %145, %146 : vector<16x1xf32>
    %148 = vector.broadcast %147 : vector<16x1xf32> to vector<16x32xf32>
    %149 = arith.subf %141, %148 : vector<16x32xf32>
    %150 = arith.mulf %149, %149 : vector<16x32xf32>
    %cst_55 = arith.constant dense<0.000000e+00> : vector<16xf32>
    %151 = vector.multi_reduction <add>, %150, %cst_55 [1] : vector<16x32xf32> to vector<16xf32>
    %152 = vector.shape_cast %151 : vector<16xf32> to vector<16x1xf32>
    %cst_56 = arith.constant 3.100000e+01 : f32
    %153 = vector.broadcast %cst_56 : f32 to vector<16x1xf32>
    %154 = arith.divf %152, %153 : vector<16x1xf32>
    %155 = math.sqrt %154 : vector<16x1xf32>
    %cst_57 = arith.constant 9.99999997E-7 : f32
    %156 = vector.broadcast %cst_57 : f32 to vector<16x1xf32>
    %157 = arith.addf %155, %156 : vector<16x1xf32>
    %158 = tpu.reciprocal %157 {approx = true} : vector<16x1xf32> -> vector<16x1xf32>
    %159 = vector.broadcast %147 : vector<16x1xf32> to vector<16x32xf32>
    %160 = arith.subf %141, %159 : vector<16x32xf32>
    %161 = vector.broadcast %142 : vector<1x32xf32> to vector<16x32xf32>
    %162 = arith.mulf %161, %160 : vector<16x32xf32>
    %163 = vector.broadcast %158 : vector<16x1xf32> to vector<16x32xf32>
    %164 = arith.mulf %162, %163 : vector<16x32xf32>
    %165 = vector.broadcast %143 : vector<1x32xf32> to vector<16x32xf32>
    %166 = arith.addf %164, %165 : vector<16x32xf32>
    %c0_58 = arith.constant 0 : index
    %c0_59 = arith.constant 0 : index
    %167 = vector.load %arg12[%c0_58, %c0_59] : memref<32x32xf32, #tpu.memory_space<vmem>>, vector<32x32xf32>
    %cst_60 = arith.constant dense<0.000000e+00> : vector<16x32xf32>
    %168 = tpu.matmul %166, %167, %cst_60 {dimension_numbers = #tpu.dot_dimension_numbers<[1], [0], [0], [1], [0, 0, 1, 1], [], []>} : vector<16x32xf32>, vector<32x32xf32>, vector<16x32xf32> -> vector<16x32xf32>
    %c0_61 = arith.constant 0 : index
    %c0_62 = arith.constant 0 : index
    %169 = vector.load %arg13[%c0_61, %c0_62] : memref<1x32xf32, #tpu.memory_space<vmem>>, vector<1x32xf32>
    %170 = vector.broadcast %169 : vector<1x32xf32> to vector<16x32xf32>
    %171 = arith.addf %168, %170 : vector<16x32xf32>
    %c0_63 = arith.constant 0 : index
    %c0_64 = arith.constant 0 : index
    %172 = vector.load %arg14[%c0_63, %c0_64] : memref<32x64xf32, #tpu.memory_space<vmem>>, vector<32x64xf32>
    %cst_65 = arith.constant dense<0.000000e+00> : vector<16x64xf32>
    %173 = tpu.matmul %3, %172, %cst_65 {dimension_numbers = #tpu.dot_dimension_numbers<[1], [0], [0], [1], [0, 0, 1, 1], [], []>} : vector<16x32xf32>, vector<32x64xf32>, vector<16x64xf32> -> vector<16x64xf32>
    %c0_66 = arith.constant 0 : index
    %c0_67 = arith.constant 0 : index
    %174 = vector.load %arg15[%c0_66, %c0_67] : memref<1x64xf32, #tpu.memory_space<vmem>>, vector<1x64xf32>
    %175 = vector.broadcast %174 : vector<1x64xf32> to vector<16x64xf32>
    %176 = arith.addf %173, %175 : vector<16x64xf32>
    %177 = vector.extract_strided_slice %176 {offsets = [0, 0], sizes = [16, 32], strides = [1, 1]} : vector<16x64xf32> to vector<16x32xf32>
    %178 = vector.extract_strided_slice %176 {offsets = [0, 32], sizes = [16, 32], strides = [1, 1]} : vector<16x64xf32> to vector<16x32xf32>
    %c0_68 = arith.constant 0 : index
    %c0_69 = arith.constant 0 : index
    %c0_70 = arith.constant 0 : index
    %179 = vector.load %arg3[%c0_68, %c0_69, %c0_70] : memref<2x1x8xf32, #tpu.memory_space<vmem>>, vector<2x1x8xf32>
    %180 = vector.extract_strided_slice %171 {offsets = [0, 0], sizes = [16, 8], strides = [1, 1]} : vector<16x32xf32> to vector<16x8xf32>
    %181 = vector.shape_cast %180 : vector<16x8xf32> to vector<2x8x8xf32>
    %182 = vector.extract_strided_slice %177 {offsets = [0, 0], sizes = [16, 8], strides = [1, 1]} : vector<16x32xf32> to vector<16x8xf32>
    %183 = vector.shape_cast %182 : vector<16x8xf32> to vector<2x8x8xf32>
    %184 = vector.extract_strided_slice %178 {offsets = [0, 0], sizes = [16, 8], strides = [1, 1]} : vector<16x32xf32> to vector<16x8xf32>
    %185 = vector.shape_cast %184 : vector<16x8xf32> to vector<2x8x8xf32>
    "tpu.trace_start"() <{level = 10 : i32, message = "bqd,bkd->bqk"}> : () -> ()
    %cst_71 = arith.constant dense<0.000000e+00> : vector<2x8x8xf32>
    %186 = tpu.matmul %181, %183, %cst_71 {dimension_numbers = #tpu.dot_dimension_numbers<[2], [2], [1], [1], [0, 0, 0, 1, 1, 1], [0], [0]>} : vector<2x8x8xf32>, vector<2x8x8xf32>, vector<2x8x8xf32> -> vector<2x8x8xf32>
    "tpu.trace_stop"() : () -> ()
    %cst_72 = arith.constant 0.353553385 : f32
    %187 = vector.broadcast %cst_72 : f32 to vector<2x8x8xf32>
    %188 = arith.mulf %186, %187 : vector<2x8x8xf32>
    %189 = vector.broadcast %179 : vector<2x1x8xf32> to vector<2x8x8xf32>
    %190 = arith.addf %188, %189 : vector<2x8x8xf32>
    %cst_73 = arith.constant dense<0xFF800000> : vector<2x8xf32>
    %191 = vector.multi_reduction <maximumf>, %190, %cst_73 [2] : vector<2x8x8xf32> to vector<2x8xf32>
    %192 = vector.shape_cast %191 : vector<2x8xf32> to vector<2x8x1xf32>
    %193 = vector.broadcast %192 : vector<2x8x1xf32> to vector<2x8x8xf32>
    %194 = arith.subf %190, %193 : vector<2x8x8xf32>
    %195 = math.exp %194 : vector<2x8x8xf32>
    %cst_74 = arith.constant dense<0.000000e+00> : vector<2x8xf32>
    %196 = vector.multi_reduction <add>, %195, %cst_74 [2] : vector<2x8x8xf32> to vector<2x8xf32>
    %197 = vector.shape_cast %196 : vector<2x8xf32> to vector<2x8x1xf32>
    %198 = tpu.reciprocal %197 {approx = true} : vector<2x8x1xf32> -> vector<2x8x1xf32>
    %199 = vector.broadcast %198 : vector<2x8x1xf32> to vector<2x8x8xf32>
    %200 = arith.mulf %195, %199 : vector<2x8x8xf32>
    "tpu.trace_start"() <{level = 10 : i32, message = "bqk,bkd->bqd"}> : () -> ()
    %cst_75 = arith.constant dense<0.000000e+00> : vector<2x8x8xf32>
    %201 = tpu.matmul %200, %185, %cst_75 {dimension_numbers = #tpu.dot_dimension_numbers<[2], [1], [1], [2], [0, 0, 0, 1, 1, 2], [0], [0]>} : vector<2x8x8xf32>, vector<2x8x8xf32>, vector<2x8x8xf32> -> vector<2x8x8xf32>
    "tpu.trace_stop"() : () -> ()
    %202 = vector.shape_cast %201 : vector<2x8x8xf32> to vector<16x8xf32>
    %203 = vector.extract_strided_slice %171 {offsets = [0, 8], sizes = [16, 8], strides = [1, 1]} : vector<16x32xf32> to vector<16x8xf32>
    %204 = vector.shape_cast %203 : vector<16x8xf32> to vector<2x8x8xf32>
    %205 = vector.extract_strided_slice %177 {offsets = [0, 8], sizes = [16, 8], strides = [1, 1]} : vector<16x32xf32> to vector<16x8xf32>
    %206 = vector.shape_cast %205 : vector<16x8xf32> to vector<2x8x8xf32>
    %207 = vector.extract_strided_slice %178 {offsets = [0, 8], sizes = [16, 8], strides = [1, 1]} : vector<16x32xf32> to vector<16x8xf32>
    %208 = vector.shape_cast %207 : vector<16x8xf32> to vector<2x8x8xf32>
    "tpu.trace_start"() <{level = 10 : i32, message = "bqd,bkd->bqk"}> : () -> ()
    %cst_76 = arith.constant dense<0.000000e+00> : vector<2x8x8xf32>
    %209 = tpu.matmul %204, %206, %cst_76 {dimension_numbers = #tpu.dot_dimension_numbers<[2], [2], [1], [1], [0, 0, 0, 1, 1, 1], [0], [0]>} : vector<2x8x8xf32>, vector<2x8x8xf32>, vector<2x8x8xf32> -> vector<2x8x8xf32>
    "tpu.trace_stop"() : () -> ()
    %cst_77 = arith.constant 0.353553385 : f32
    %210 = vector.broadcast %cst_77 : f32 to vector<2x8x8xf32>
    %211 = arith.mulf %209, %210 : vector<2x8x8xf32>
    %212 = vector.broadcast %179 : vector<2x1x8xf32> to vector<2x8x8xf32>
    %213 = arith.addf %211, %212 : vector<2x8x8xf32>
    %cst_78 = arith.constant dense<0xFF800000> : vector<2x8xf32>
    %214 = vector.multi_reduction <maximumf>, %213, %cst_78 [2] : vector<2x8x8xf32> to vector<2x8xf32>
    %215 = vector.shape_cast %214 : vector<2x8xf32> to vector<2x8x1xf32>
    %216 = vector.broadcast %215 : vector<2x8x1xf32> to vector<2x8x8xf32>
    %217 = arith.subf %213, %216 : vector<2x8x8xf32>
    %218 = math.exp %217 : vector<2x8x8xf32>
    %cst_79 = arith.constant dense<0.000000e+00> : vector<2x8xf32>
    %219 = vector.multi_reduction <add>, %218, %cst_79 [2] : vector<2x8x8xf32> to vector<2x8xf32>
    %220 = vector.shape_cast %219 : vector<2x8xf32> to vector<2x8x1xf32>
    %221 = tpu.reciprocal %220 {approx = true} : vector<2x8x1xf32> -> vector<2x8x1xf32>
    %222 = vector.broadcast %221 : vector<2x8x1xf32> to vector<2x8x8xf32>
    %223 = arith.mulf %218, %222 : vector<2x8x8xf32>
    "tpu.trace_start"() <{level = 10 : i32, message = "bqk,bkd->bqd"}> : () -> ()
    %cst_80 = arith.constant dense<0.000000e+00> : vector<2x8x8xf32>
    %224 = tpu.matmul %223, %208, %cst_80 {dimension_numbers = #tpu.dot_dimension_numbers<[2], [1], [1], [2], [0, 0, 0, 1, 1, 2], [0], [0]>} : vector<2x8x8xf32>, vector<2x8x8xf32>, vector<2x8x8xf32> -> vector<2x8x8xf32>
    "tpu.trace_stop"() : () -> ()
    %225 = vector.shape_cast %224 : vector<2x8x8xf32> to vector<16x8xf32>
    %226 = vector.extract_strided_slice %171 {offsets = [0, 16], sizes = [16, 8], strides = [1, 1]} : vector<16x32xf32> to vector<16x8xf32>
    %227 = vector.shape_cast %226 : vector<16x8xf32> to vector<2x8x8xf32>
    %228 = vector.extract_strided_slice %177 {offsets = [0, 16], sizes = [16, 8], strides = [1, 1]} : vector<16x32xf32> to vector<16x8xf32>
    %229 = vector.shape_cast %228 : vector<16x8xf32> to vector<2x8x8xf32>
    %230 = vector.extract_strided_slice %178 {offsets = [0, 16], sizes = [16, 8], strides = [1, 1]} : vector<16x32xf32> to vector<16x8xf32>
    %231 = vector.shape_cast %230 : vector<16x8xf32> to vector<2x8x8xf32>
    "tpu.trace_start"() <{level = 10 : i32, message = "bqd,bkd->bqk"}> : () -> ()
    %cst_81 = arith.constant dense<0.000000e+00> : vector<2x8x8xf32>
    %232 = tpu.matmul %227, %229, %cst_81 {dimension_numbers = #tpu.dot_dimension_numbers<[2], [2], [1], [1], [0, 0, 0, 1, 1, 1], [0], [0]>} : vector<2x8x8xf32>, vector<2x8x8xf32>, vector<2x8x8xf32> -> vector<2x8x8xf32>
    "tpu.trace_stop"() : () -> ()
    %cst_82 = arith.constant 0.353553385 : f32
    %233 = vector.broadcast %cst_82 : f32 to vector<2x8x8xf32>
    %234 = arith.mulf %232, %233 : vector<2x8x8xf32>
    %235 = vector.broadcast %179 : vector<2x1x8xf32> to vector<2x8x8xf32>
    %236 = arith.addf %234, %235 : vector<2x8x8xf32>
    %cst_83 = arith.constant dense<0xFF800000> : vector<2x8xf32>
    %237 = vector.multi_reduction <maximumf>, %236, %cst_83 [2] : vector<2x8x8xf32> to vector<2x8xf32>
    %238 = vector.shape_cast %237 : vector<2x8xf32> to vector<2x8x1xf32>
    %239 = vector.broadcast %238 : vector<2x8x1xf32> to vector<2x8x8xf32>
    %240 = arith.subf %236, %239 : vector<2x8x8xf32>
    %241 = math.exp %240 : vector<2x8x8xf32>
    %cst_84 = arith.constant dense<0.000000e+00> : vector<2x8xf32>
    %242 = vector.multi_reduction <add>, %241, %cst_84 [2] : vector<2x8x8xf32> to vector<2x8xf32>
    %243 = vector.shape_cast %242 : vector<2x8xf32> to vector<2x8x1xf32>
    %244 = tpu.reciprocal %243 {approx = true} : vector<2x8x1xf32> -> vector<2x8x1xf32>
    %245 = vector.broadcast %244 : vector<2x8x1xf32> to vector<2x8x8xf32>
    %246 = arith.mulf %241, %245 : vector<2x8x8xf32>
    "tpu.trace_start"() <{level = 10 : i32, message = "bqk,bkd->bqd"}> : () -> ()
    %cst_85 = arith.constant dense<0.000000e+00> : vector<2x8x8xf32>
    %247 = tpu.matmul %246, %231, %cst_85 {dimension_numbers = #tpu.dot_dimension_numbers<[2], [1], [1], [2], [0, 0, 0, 1, 1, 2], [0], [0]>} : vector<2x8x8xf32>, vector<2x8x8xf32>, vector<2x8x8xf32> -> vector<2x8x8xf32>
    "tpu.trace_stop"() : () -> ()
    %248 = vector.shape_cast %247 : vector<2x8x8xf32> to vector<16x8xf32>
    %249 = vector.extract_strided_slice %171 {offsets = [0, 24], sizes = [16, 8], strides = [1, 1]} : vector<16x32xf32> to vector<16x8xf32>
    %250 = vector.shape_cast %249 : vector<16x8xf32> to vector<2x8x8xf32>
    %251 = vector.extract_strided_slice %177 {offsets = [0, 24], sizes = [16, 8], strides = [1, 1]} : vector<16x32xf32> to vector<16x8xf32>
    %252 = vector.shape_cast %251 : vector<16x8xf32> to vector<2x8x8xf32>
    %253 = vector.extract_strided_slice %178 {offsets = [0, 24], sizes = [16, 8], strides = [1, 1]} : vector<16x32xf32> to vector<16x8xf32>
    %254 = vector.shape_cast %253 : vector<16x8xf32> to vector<2x8x8xf32>
    "tpu.trace_start"() <{level = 10 : i32, message = "bqd,bkd->bqk"}> : () -> ()
    %cst_86 = arith.constant dense<0.000000e+00> : vector<2x8x8xf32>
    %255 = tpu.matmul %250, %252, %cst_86 {dimension_numbers = #tpu.dot_dimension_numbers<[2], [2], [1], [1], [0, 0, 0, 1, 1, 1], [0], [0]>} : vector<2x8x8xf32>, vector<2x8x8xf32>, vector<2x8x8xf32> -> vector<2x8x8xf32>
    "tpu.trace_stop"() : () -> ()
    %cst_87 = arith.constant 0.353553385 : f32
    %256 = vector.broadcast %cst_87 : f32 to vector<2x8x8xf32>
    %257 = arith.mulf %255, %256 : vector<2x8x8xf32>
    %258 = vector.broadcast %179 : vector<2x1x8xf32> to vector<2x8x8xf32>
    %259 = arith.addf %257, %258 : vector<2x8x8xf32>
    %cst_88 = arith.constant dense<0xFF800000> : vector<2x8xf32>
    %260 = vector.multi_reduction <maximumf>, %259, %cst_88 [2] : vector<2x8x8xf32> to vector<2x8xf32>
    %261 = vector.shape_cast %260 : vector<2x8xf32> to vector<2x8x1xf32>
    %262 = vector.broadcast %261 : vector<2x8x1xf32> to vector<2x8x8xf32>
    %263 = arith.subf %259, %262 : vector<2x8x8xf32>
    %264 = math.exp %263 : vector<2x8x8xf32>
    %cst_89 = arith.constant dense<0.000000e+00> : vector<2x8xf32>
    %265 = vector.multi_reduction <add>, %264, %cst_89 [2] : vector<2x8x8xf32> to vector<2x8xf32>
    %266 = vector.shape_cast %265 : vector<2x8xf32> to vector<2x8x1xf32>
    %267 = tpu.reciprocal %266 {approx = true} : vector<2x8x1xf32> -> vector<2x8x1xf32>
    %268 = vector.broadcast %267 : vector<2x8x1xf32> to vector<2x8x8xf32>
    %269 = arith.mulf %264, %268 : vector<2x8x8xf32>
    "tpu.trace_start"() <{level = 10 : i32, message = "bqk,bkd->bqd"}> : () -> ()
    %cst_90 = arith.constant dense<0.000000e+00> : vector<2x8x8xf32>
    %270 = tpu.matmul %269, %254, %cst_90 {dimension_numbers = #tpu.dot_dimension_numbers<[2], [1], [1], [2], [0, 0, 0, 1, 1, 2], [0], [0]>} : vector<2x8x8xf32>, vector<2x8x8xf32>, vector<2x8x8xf32> -> vector<2x8x8xf32>
    "tpu.trace_stop"() : () -> ()
    %271 = vector.shape_cast %270 : vector<2x8x8xf32> to vector<16x8xf32>
    %c0_91 = arith.constant 0 : index
    %c0_92 = arith.constant 0 : index
    %272 = vector.load %arg16[%c0_91, %c0_92] : memref<32x32xf32, #tpu.memory_space<vmem>>, vector<32x32xf32>
    %c0_93 = arith.constant 0 : index
    %c0_94 = arith.constant 0 : index
    %273 = vector.load %arg17[%c0_93, %c0_94] : memref<1x32xf32, #tpu.memory_space<vmem>>, vector<1x32xf32>
    %274 = vector.extract_strided_slice %272 {offsets = [0, 0], sizes = [8, 32], strides = [1, 1]} : vector<32x32xf32> to vector<8x32xf32>
    %cst_95 = arith.constant dense<0.000000e+00> : vector<16x32xf32>
    %275 = tpu.matmul %202, %274, %cst_95 {dimension_numbers = #tpu.dot_dimension_numbers<[1], [0], [0], [1], [0, 0, 1, 1], [], []>} : vector<16x8xf32>, vector<8x32xf32>, vector<16x32xf32> -> vector<16x32xf32>
    %276 = vector.extract_strided_slice %272 {offsets = [8, 0], sizes = [8, 32], strides = [1, 1]} : vector<32x32xf32> to vector<8x32xf32>
    %cst_96 = arith.constant dense<0.000000e+00> : vector<16x32xf32>
    %277 = tpu.matmul %225, %276, %cst_96 {dimension_numbers = #tpu.dot_dimension_numbers<[1], [0], [0], [1], [0, 0, 1, 1], [], []>} : vector<16x8xf32>, vector<8x32xf32>, vector<16x32xf32> -> vector<16x32xf32>
    %278 = arith.addf %275, %277 : vector<16x32xf32>
    %279 = vector.extract_strided_slice %272 {offsets = [16, 0], sizes = [8, 32], strides = [1, 1]} : vector<32x32xf32> to vector<8x32xf32>
    %cst_97 = arith.constant dense<0.000000e+00> : vector<16x32xf32>
    %280 = tpu.matmul %248, %279, %cst_97 {dimension_numbers = #tpu.dot_dimension_numbers<[1], [0], [0], [1], [0, 0, 1, 1], [], []>} : vector<16x8xf32>, vector<8x32xf32>, vector<16x32xf32> -> vector<16x32xf32>
    %281 = arith.addf %278, %280 : vector<16x32xf32>
    %282 = vector.extract_strided_slice %272 {offsets = [24, 0], sizes = [8, 32], strides = [1, 1]} : vector<32x32xf32> to vector<8x32xf32>
    %cst_98 = arith.constant dense<0.000000e+00> : vector<16x32xf32>
    %283 = tpu.matmul %271, %282, %cst_98 {dimension_numbers = #tpu.dot_dimension_numbers<[1], [0], [0], [1], [0, 0, 1, 1], [], []>} : vector<16x8xf32>, vector<8x32xf32>, vector<16x32xf32> -> vector<16x32xf32>
    %284 = arith.addf %281, %283 : vector<16x32xf32>
    %285 = vector.broadcast %273 : vector<1x32xf32> to vector<16x32xf32>
    %286 = arith.addf %284, %285 : vector<16x32xf32>
    %287 = arith.addf %141, %286 : vector<16x32xf32>
    %c0_99 = arith.constant 0 : index
    %c0_100 = arith.constant 0 : index
    %288 = vector.load %arg18[%c0_99, %c0_100] : memref<1x32xf32, #tpu.memory_space<vmem>>, vector<1x32xf32>
    %c0_101 = arith.constant 0 : index
    %c0_102 = arith.constant 0 : index
    %289 = vector.load %arg19[%c0_101, %c0_102] : memref<1x32xf32, #tpu.memory_space<vmem>>, vector<1x32xf32>
    %cst_103 = arith.constant dense<0.000000e+00> : vector<16xf32>
    %290 = vector.multi_reduction <add>, %287, %cst_103 [1] : vector<16x32xf32> to vector<16xf32>
    %291 = vector.shape_cast %290 : vector<16xf32> to vector<16x1xf32>
    %cst_104 = arith.constant 3.200000e+01 : f32
    %292 = vector.broadcast %cst_104 : f32 to vector<16x1xf32>
    %293 = arith.divf %291, %292 : vector<16x1xf32>
    %294 = vector.broadcast %293 : vector<16x1xf32> to vector<16x32xf32>
    %295 = arith.subf %287, %294 : vector<16x32xf32>
    %296 = arith.mulf %295, %295 : vector<16x32xf32>
    %cst_105 = arith.constant dense<0.000000e+00> : vector<16xf32>
    %297 = vector.multi_reduction <add>, %296, %cst_105 [1] : vector<16x32xf32> to vector<16xf32>
    %298 = vector.shape_cast %297 : vector<16xf32> to vector<16x1xf32>
    %cst_106 = arith.constant 3.100000e+01 : f32
    %299 = vector.broadcast %cst_106 : f32 to vector<16x1xf32>
    %300 = arith.divf %298, %299 : vector<16x1xf32>
    %301 = math.sqrt %300 : vector<16x1xf32>
    %cst_107 = arith.constant 9.99999997E-7 : f32
    %302 = vector.broadcast %cst_107 : f32 to vector<16x1xf32>
    %303 = arith.addf %301, %302 : vector<16x1xf32>
    %304 = tpu.reciprocal %303 {approx = true} : vector<16x1xf32> -> vector<16x1xf32>
    %305 = vector.broadcast %293 : vector<16x1xf32> to vector<16x32xf32>
    %306 = arith.subf %287, %305 : vector<16x32xf32>
    %307 = vector.broadcast %288 : vector<1x32xf32> to vector<16x32xf32>
    %308 = arith.mulf %307, %306 : vector<16x32xf32>
    %309 = vector.broadcast %304 : vector<16x1xf32> to vector<16x32xf32>
    %310 = arith.mulf %308, %309 : vector<16x32xf32>
    %311 = vector.broadcast %289 : vector<1x32xf32> to vector<16x32xf32>
    %312 = arith.addf %310, %311 : vector<16x32xf32>
    %c0_108 = arith.constant 0 : index
    %c0_109 = arith.constant 0 : index
    %313 = vector.load %arg20[%c0_108, %c0_109] : memref<32x64xf32, #tpu.memory_space<vmem>>, vector<32x64xf32>
    %cst_110 = arith.constant dense<0.000000e+00> : vector<16x64xf32>
    %314 = tpu.matmul %312, %313, %cst_110 {dimension_numbers = #tpu.dot_dimension_numbers<[1], [0], [0], [1], [0, 0, 1, 1], [], []>} : vector<16x32xf32>, vector<32x64xf32>, vector<16x64xf32> -> vector<16x64xf32>
    %c0_111 = arith.constant 0 : index
    %c0_112 = arith.constant 0 : index
    %315 = vector.load %arg21[%c0_111, %c0_112] : memref<1x64xf32, #tpu.memory_space<vmem>>, vector<1x64xf32>
    %316 = vector.broadcast %315 : vector<1x64xf32> to vector<16x64xf32>
    %317 = arith.addf %314, %316 : vector<16x64xf32>
    %cst_113 = arith.constant 0.000000e+00 : f32
    %318 = vector.broadcast %cst_113 : f32 to vector<16x64xf32>
    %319 = arith.maximumf %317, %318 : vector<16x64xf32>
    %c0_114 = arith.constant 0 : index
    %c0_115 = arith.constant 0 : index
    %320 = vector.load %arg22[%c0_114, %c0_115] : memref<64x32xf32, #tpu.memory_space<vmem>>, vector<64x32xf32>
    %cst_116 = arith.constant dense<0.000000e+00> : vector<16x32xf32>
    %321 = tpu.matmul %319, %320, %cst_116 {dimension_numbers = #tpu.dot_dimension_numbers<[1], [0], [0], [1], [0, 0, 1, 1], [], []>} : vector<16x64xf32>, vector<64x32xf32>, vector<16x32xf32> -> vector<16x32xf32>
    %322 = arith.addf %287, %321 : vector<16x32xf32>
    %c0_117 = arith.constant 0 : index
    %c0_118 = arith.constant 0 : index
    %323 = vector.load %arg23[%c0_117, %c0_118] : memref<1x32xf32, #tpu.memory_space<vmem>>, vector<1x32xf32>
    %324 = vector.broadcast %323 : vector<1x32xf32> to vector<16x32xf32>
    %325 = arith.addf %322, %324 : vector<16x32xf32>
    %326 = vector.shape_cast %325 : vector<16x32xf32> to vector<2x8x32xf32>
    %c0_119 = arith.constant 0 : index
    %c0_120 = arith.constant 0 : index
    %c0_121 = arith.constant 0 : index
    %327 = vector.load %arg24[%c0_119, %c0_120, %c0_121] : memref<2x8x32xf32, #tpu.memory_space<vmem>>, vector<2x8x32xf32>
    tpu.vector_store %arg24[%c0_119, %c0_120, %c0_121], %326 {strides = array<i32>} : memref<2x8x32xf32, #tpu.memory_space<vmem>>, vector<2x8x32xf32>,
    return
  }
}

</mosaic_0001>

<bundles_post_ra>
// kernel: decoder_layer_forward.1
= control target key start
LH: loop header
LB: loop body
LE: loop exit
PB: predicated region body
PF: predicated region fallthrough
CT: control target
= control target key end

     0   :  { %s5480_s0 = inlined_call_operand.vmem [shape: f32[2,8,32], index: 0, kind: input, shape index: {}]   ;;  %s5481_s1 = inlined_call_operand.vmem [shape: f32[2,8,32], index: 1, kind: input, shape index: {}]   ;;  %s5482_s2 = inlined_call_operand.vmem [shape: f32[2,8,8], index: 2, kind: input, shape index: {}]   ;;  %s5483_s3 = inlined_call_operand.vmem [shape: f32[2,1,8], index: 3, kind: input, shape index: {}]   ;;  %s5484_s4 = inlined_call_operand.vmem [shape: f32[1,32], index: 4, kind: input, shape index: {}]   ;;  %s5485_s5 = inlined_call_operand.vmem [shape: f32[1,32], index: 5, kind: input, shape index: {}]   ;;  %s5486_s6 = inlined_call_operand.vmem [shape: f32[32,96], index: 6, kind: input, shape index: {}]   ;;  %s5487_s7 = inlined_call_operand.vmem [shape: f32[1,96], index: 7, kind: input, shape index: {}]   ;;  %s5488_s8 = inlined_call_operand.vmem [shape: f32[32,32], index: 8, kind: input, shape index: {}]   ;;  %s5489_s9 = inlined_call_operand.vmem [shape: f32[1,32], index: 9, kind: input, shape index: {}]   ;;  %s5490_s10 = inlined_call_operand.vmem [shape: f32[1,32], index: 10, kind: input, shape index: {}]   ;;  %s5491_s11 = inlined_call_operand.vmem [shape: f32[1,32], index: 11, kind: input, shape index: {}]   ;;  %s5492_s12 = inlined_call_operand.vmem [shape: f32[32,32], index: 12, kind: input, shape index: {}]   ;;  %s5493_s13 = inlined_call_operand.vmem [shape: f32[1,32], index: 13, kind: input, shape index: {}]   ;;  %s5494_s14 = inlined_call_operand.vmem [shape: f32[32,64], index: 14, kind: input, shape index: {}]   ;;  %s5495_s15 = inlined_call_operand.vmem [shape: f32[1,64], index: 15, kind: input, shape index: {}]   ;;  %s5496_s16 = inlined_call_operand.vmem [shape: f32[32,32], index: 16, kind: input, shape index: {}]   ;;  %s5497_s17 = inlined_call_operand.vmem [shape: f32[1,32], index: 17, kind: input, shape index: {}]   ;;  %s5498_s18 = inlined_call_operand.vmem [shape: f32[1,32], index: 18, kind: input, shape index: {}]   ;;  %s5499_s19 = inlined_call_operand.vmem [shape: f32[1,32], index: 19, kind: input, shape index: {}]   ;;  %s5500_s20 = inlined_call_operand.vmem [shape: f32[32,64], index: 20, kind: input, shape index: {}]   ;;  %s5501_s21 = inlined_call_operand.vmem [shape: f32[1,64], index: 21, kind: input, shape index: {}]   ;;  %s5502_s22 = inlined_call_operand.vmem [shape: f32[64,32], index: 22, kind: input, shape index: {}]   ;;  %s5503_s23 = inlined_call_operand.vmem [shape: f32[1,32], index: 23, kind: input, shape index: {}]   ;;  %s5504_s24 = inlined_call_operand.hbm [shape: f32[2,8,32], index: 24, kind: output, shape index: {}]  }
   0x1   :  { %5511 = sst [smem:[#allocation5_spill]] %s5480_s0 }
   0x2   :  { %5512 = sst [smem:[#allocation6_spill]] %s5481_s1 }
   0x3   :  { %5513 = sst [smem:[#allocation7_spill]] %s5482_s2 }
   0x4   :  { %5514 = sst [smem:[#allocation8_spill]] %s5483_s3 }
   0x5   :  { %5515 = sst [smem:[#allocation9_spill]] %s5484_s4 }
   0x6   :  { %5516 = sst [smem:[#allocation10_spill]] %s5485_s5 }
   0x7   :  { %5517 = sst [smem:[#allocation11_spill]] %s5486_s6 }
   0x8   :  { %5518 = sst [smem:[#allocation12_spill]] %s5487_s7 }
   0x9   :  { %5519 = sst [smem:[#allocation13_spill]] %s5488_s8 }
   0xa   :  { %s5520_s27 = sld [smem:[#allocation5_spill]]  ;;  %vm84_vm0 = vcmask 261120  }
  0x10   :  { %v4923_v0 = vld [vmem:[%s5520_s27] sm:$0xff]  ;;  %v4928_v1 = vld [vmem:[%s5520_s27 + $0x8] sm:$0xff] }
  0x11   :  { %v85_v2 = vsel %vm84_vm0, %v4923_v0, 0.0 }
  0x12   :  { %29 = vsyncpa [#allocation3], 0  ;;  %86 = vadd.xlane.f32.xlu0 %v85_v2  ;;  %v88_v3 = vsel %vm84_vm0, %v4928_v1, 0.0  ;;  %s5521_s0 = sld [smem:[#allocation11_spill]]  ;;  %s5522_s26 = sld [smem:[#allocation9_spill]]  ;;  %v4779_v46 = vmov 0.0  }
  0x13   :  { %s5523_s6 = sld [smem:[#allocation10_spill]]  ;;  %4344 = vmatprep.subr.mxu1 %v4779_v46  ;;  %vm4780_vm5 = vmmov 0   ;;  %s4781_s7 = smov 96   ;;  %vm240_vm6 = vcmask 64512   ;;  %vm4006_vm15 = vcmask 523264  }
  0x14   :  { %4346 = vmatprep.mubr.msk.f32.mxu1 %vm4780_vm5, %v4779_v46  ;;  %s5525_s25 = sld [smem:[#allocation7_spill]]  ;;  %s4782_s1 = smov 64  }
  0x15   :  { %s4783_s5 = smov 88   ;;  %s4785_s27 = smov 56  }
  0x16   :  { %89 = vadd.xlane.f32.xlu0 %v88_v3  ;;  %s4786_s28 = smov 80   ;;  %s4788_s2 = smov 48  }
  0x17   :  { %s4789_s29 = smov 72   ;;  %s4791_s30 = smov 40  }
  0x18   :  { %v143_v14 = vld [vmem:[%s5521_s0] sm:$0xff]  ;;  %v144_v15 = vld [vmem:[%s5521_s0 + $0x8] sm:$0xff]  ;;  %v145_v16 = vld [vmem:[%s5521_s0 + $0x10] sm:$0xff]  ;;  %s5526_s8 = sld [smem:[#allocation13_spill]]  ;;  %s5528_s3 = sld [smem:[#allocation8_spill]] }
  0x19   :  { %v4591_v17 = vpack.c.bf16 %v144_v15, %v143_v14  ;;  %v146_v18 = vld [vmem:[%s5521_s0 + $0x18] sm:$0xff]  ;;  %v4117_v36 = vld [vmem:[%s5522_s26] ss:$0 sm:$0xff]  ;;  %s5524_s0 = sld [smem:[#allocation12_spill]]  ;;  %s4784_s26 = smov 120  }
  0x1a   :  { %v4595_v19 = vpack.c.bf16 %v146_v18, %v145_v16  ;;  %v4118_v39 = vld [vmem:[%s5523_s6] ss:$0 sm:$0xff]  ;;  %v4990_v55 = vld [vmem:[%s5525_s25 + $0x8] sm:$0xff]  ;;  %s4787_s6 = smov 112  }
  0x1b   :  { %4592 = vmatprep.subr.bf16.mxu0 %v4591_v17  ;;  %v4995_v59 = vld [vmem:[%s5525_s25] sm:$0xff] }
  0x1c   :  { %4594 = vmatpush3.bf16.msra.mxu0 %v4591_v17 }
  0x1d   :  { %4596 = vmatprep.subr.bf16.mxu0 %v4595_v19 }
  0x1f   :  { %v4119_v47 = vld [vmem:[%s5524_s0] ss:$0 sm:$0xff]  ;;  %s4790_s0 = smov 104  }
  0x20   :  { %4598 = vmatpush3.bf16.msra.mxu0 %v4595_v19 }
  0x21   :  { %4339 = vmatprep.subr.mxu0 %v4779_v46 }
  0x9f   :  { %v87_v4 = vpop.xlane.xlu0 %86 }
  0xa0   :  { %v92_v5 = vmul.f32 0.03125, %v87_v4 }
  0xa2   :  { %v94_v6 = vsub.f32 %v4923_v0, %v92_v5 }
  0xa3   :  { %v90_v7 = vpop.xlane.xlu0 %89 }
  0xa4   :  { %v93_v8 = vmul.f32 0.03125, %v90_v7  ;;  %v96_v9 = vmul.f32 %v94_v6, %v94_v6  ;;  %v131_v37 = vmul.f32 %v4117_v36, %v94_v6 }
  0xa6   :  { %v95_v10 = vsub.f32 %v4928_v1, %v93_v8  ;;  %v98_v11 = vsel %vm84_vm0, %v96_v9, 0.0 }
  0xa7   :  { %99 = vadd.xlane.f32.xlu1 %v98_v11 }
  0xa8   :  { %v97_v12 = vmul.f32 %v95_v10, %v95_v10  ;;  %v132_v41 = vmul.f32 %v4117_v36, %v95_v10 }
  0xaa   :  { %v101_v13 = vsel %vm84_vm0, %v97_v12, 0.0 }
  0xab   :  { %102 = vadd.xlane.f32.xlu1 %v101_v13 }
 0x134   :  { %v100_v20 = vpop.xlane.xlu1 %99 }
 0x135   :  { %v105_v21 = vmul.f32 0.032258064, %v100_v20 }
 0x137   :  { %4667 = vrsqrt.f32 %v105_v21  ;;  %vm109_vm1 = vcmp.eq.f32.partialorder %v105_v21, inf  ;;  %v112_v26 = vand.u32 2147483648, %v105_v21  ;;  %vm111_vm2 = vcmp.eq.f32.partialorder %v105_v21, 0.0 }
 0x138   :  { %v103_v22 = vpop.xlane.xlu1 %102 }
 0x139   :  { %v106_v23 = vmul.f32 0.032258064, %v103_v22 }
 0x13b   :  { %4669 = vrsqrt.f32 %v106_v23  ;;  %vm116_vm3 = vcmp.eq.f32.partialorder %v106_v23, inf  ;;  %v119_v32 = vand.u32 2147483648, %v106_v23  ;;  %vm118_vm4 = vcmp.eq.f32.partialorder %v106_v23, 0.0 }
 0x141   :  { %v4668_v24 = vpop.eup %4667 }
 0x142   :  { %v108_v25 = vmul.f32 %v4668_v24, %v105_v21 }
 0x144   :  { %v110_v27 = vsel %vm109_vm1, %v105_v21, %v108_v25 }
 0x145   :  { %v4670_v28 = vpop.eup %4669  ;;  %v113_v29 = vsel %vm111_vm2, %v112_v26, %v110_v27 }
 0x146   :  { %v115_v30 = vmul.f32 %v4670_v28, %v106_v23  ;;  %v121_v31 = vadd.f32 1e-06, %v113_v29 }
 0x148   :  { %v117_v33 = vsel %vm116_vm3, %v106_v23, %v115_v30  ;;  %4671 = vrcp.f32 %v121_v31 }
 0x149   :  { %v120_v34 = vsel %vm118_vm4, %v119_v32, %v117_v33 }
 0x14a   :  { %v122_v35 = vadd.f32 1e-06, %v120_v34 }
 0x14c   :  { %4673 = vrcp.f32 %v122_v35 }
 0x152   :  { %v4672_v38 = vpop.eup %4671 }
 0x153   :  { %v133_v40 = vmul.f32 %v4672_v38, %v131_v37 }
 0x155   :  { %v141_v42 = vadd.f32 %v4118_v39, %v133_v40 }
 0x156   :  { %v4674_v43 = vpop.eup %4673 }
 0x157   :  { %v134_v44 = vmul.f32 %v4674_v43, %v132_v41  ;;  %4336 = vmatprep.mubr.msk.f32.mxu0 %vm84_vm0, %v141_v42 }
 0x159   :  { %v142_v45 = vadd.f32 %v4118_v39, %v134_v44 }
 0x15b   :  { %4337 = vmatmul.mubr.msk.f32.vlgmr.msra.gmra.mrb[0].mxu0 %vm84_vm0, %v142_v45 }
 0x15c   :  { %4341 = vmatprep.mubr.msk.f32.mxu0 %vm4780_vm5, %v4779_v46 }
 0x22e   :  { %v4338_v48 = vpop.f32.mrb[0].mxu0 }
 0x22f   :  { %v4967_v49 = vadd.f32 %v4338_v48, %v4119_v47  ;;  %v226_v50 = vpop.f32.mrb[1].mxu0 }
 0x230   :  { %v4969_v51 = vadd.f32 %v4119_v47, %v226_v50 }
 0x231   :  { %316 = vrot.lane.b32.xlu1 %v4967_v49, %s4781_s7 }
 0x232   :  { %238 = vrot.lane.b32.xlu0 %v4969_v51, %s4781_s7 }
 0x2a3   :  { %v317_v52 = vpop.permute.xlu1 %316 }
 0x2a4   :  { %4345 = vmatpush3.xpose.msk.msra.mxu1 %vm240_vm6, %v317_v52  ;;  %v239_v53 = vpop.permute.xlu0 %238 }
 0x2a5   :  { %4340 = vmatpush3.xpose.msk.msra.mxu0 %vm240_vm6, %v239_v53  ;;  %4354 = vmatprep.subr.mxu1 %v4779_v46 }
 0x2a6   :  { %4349 = vmatprep.subr.mxu0 %v4779_v46 }
 0x2a7   :  { %4347 = vmatmul.mubr.msk.f32.vlgmr.msra.gmra.mrb[0].mxu1 %vm240_vm6, %v4967_v49 }
 0x2a8   :  { %4342 = vmatmul.mubr.msk.f32.vlgmr.msra.gmra.mrb[2].mxu0 %vm240_vm6, %v4969_v51  ;;  %4356 = vmatprep.mubr.msk.f32.mxu1 %vm4780_vm5, %v4779_v46 }
 0x2a9   :  { %4351 = vmatprep.mubr.msk.f32.mxu0 %vm4780_vm5, %v4779_v46 }
 0x37a   :  { %v388_v54 = vpop.f32.mrb[0].mxu1 }
 0x37b   :  { %v393_v56 = vmul.f32 0.35355338, %v388_v54  ;;  %v311_v57 = vpop.f32.mrb[2].mxu0  ;;  %v4348_v58 = vpop.f32.mrb[1].mxu1 }
 0x37c   :  { %v392_v60 = vmul.f32 0.35355338, %v311_v57  ;;  %v4343_v61 = vpop.f32.mrb[3].mxu0 }
 0x37d   :  { %v395_v62 = vadd.f32 %v393_v56, %v4990_v55 }
 0x37e   :  { %v394_v63 = vadd.f32 %v392_v60, %v4995_v59 }
 0x37f   :  { %v399_v2 = vsel %vm240_vm6, %v395_v62, -inf }
 0x380   :  { %400 = vmax.xlane.f32.xlu0 %v399_v2  ;;  %v396_v3 = vsel %vm240_vm6, %v394_v63, -inf }
 0x381   :  { %397 = vmax.xlane.f32.xlu1 %v396_v3 }
 0x392   :  { %494 = vrot.lane.b32.xlu1 %v4967_v49, %s4782_s1 }
 0x396   :  { %418 = vrot.lane.b32.xlu0 %v4969_v51, %s4782_s1  ;;  %572 = vrot.lane.b32.xlu1 %v4969_v51, %s4783_s5  ;;  %s5527_s1 = sld [smem:[#allocation6_spill]] }
 0x39a   :  { %650 = vrot.lane.b32.xlu1 %v4967_v49, %s4783_s5 }
 0x40d   :  { %v401_v4 = vpop.xlane.xlu0 %400 }
 0x40e   :  { %v403_v5 = vsub.f32 %v395_v62, %v401_v4  ;;  %v398_v6 = vpop.xlane.xlu1 %397 }
 0x40f   :  { %v402_v7 = vsub.f32 %v394_v63, %v398_v6 }
 0x410   :  { %v406_v8 = vmul.f32 1.442695, %v403_v5 }
 0x411   :  { %v404_v9 = vmul.f32 1.442695, %v402_v7  ;;  %v419_v10 = vpop.permute.xlu0 %418 }
 0x412   :  { %4675 = vpow2.f32 %v406_v8  ;;  %v495_v11 = vpop.permute.xlu1 %494  ;;  %4350 = vmatpush3.msra.mxu0 %v419_v10 }
 0x413   :  { %4677 = vpow2.f32 %v404_v9  ;;  %4355 = vmatpush3.msra.mxu1 %v495_v11  ;;  %4359 = vmatprep.subr.mxu0 %v4779_v46 }
 0x414   :  { %4364 = vmatprep.subr.mxu1 %v4779_v46 }
 0x416   :  { %v573_v16 = vpop.permute.xlu1 %572 }
 0x41a   :  { %v651_v17 = vpop.permute.xlu1 %650 }
 0x41c   :  { %v4676_v12 = vpop.eup %4675 }
 0x41d   :  { %v4678_v13 = vpop.eup %4677  ;;  %v411_v14 = vsel %vm240_vm6, %v4676_v12, 0.0 }
 0x41e   :  { %412 = vadd.xlane.f32.xlu1 %v411_v14  ;;  %v408_v15 = vsel %vm240_vm6, %v4678_v13, 0.0 }
 0x41f   :  { %409 = vadd.xlane.f32.xlu0 %v408_v15 }
 0x42f   :  { %648 = vrot.lane.b32.xlu1 %v4967_v49, %s4784_s26 }
 0x435   :  { %570 = vrot.lane.b32.xlu0 %v4969_v51, %s4784_s26 }
 0x4ab   :  { %v413_v18 = vpop.xlane.xlu1 %412 }
 0x4ac   :  { %4679 = vrcp.f32 %v413_v18  ;;  %v410_v19 = vpop.xlane.xlu0 %409 }
 0x4ad   :  { %4681 = vrcp.f32 %v410_v19 }
 0x4af   :  { %v649_v24 = vpop.permute.xlu1 %648 }
 0x4b0   :  { %v571_v25 = vpop.permute.xlu0 %570 }
 0x4b6   :  { %v4680_v20 = vpop.eup %4679 }
 0x4b7   :  { %v4682_v21 = vpop.eup %4681  ;;  %v417_v22 = vmul.f32 %v4680_v20, %v4676_v12 }
 0x4b8   :  { %v416_v23 = vmul.f32 %v4682_v21, %v4678_v13 }
 0x4b9   :  { %4357 = vmatmul.mubr.msk.f32.vlgmr.msra.gmra.mrb[2].mxu1 %vm240_vm6, %v417_v22 }
 0x4ba   :  { %4365 = vmatpush3.xpose.msk.msra.mxu1 %vm240_vm6, %v651_v17  ;;  %4352 = vmatmul.mubr.msk.f32.vlgmr.msra.gmra.mrb[4].mxu0 %vm240_vm6, %v416_v23 }
 0x4bb   :  { %4360 = vmatpush3.xpose.msk.msra.mxu0 %vm240_vm6, %v573_v16  ;;  %4366 = vmatprep.mubr.msk.f32.mxu1 %vm4780_vm5, %v4779_v46 }
 0x4bc   :  { %4361 = vmatprep.mubr.msk.f32.mxu0 %vm4780_vm5, %v4779_v46  ;;  %4374 = vmatprep.subr.mxu1 %v4779_v46 }
 0x4bd   :  { %4367 = vmatmul.mubr.msk.f32.vlgmr.msra.gmra.mrb[4].mxu1 %vm240_vm6, %v649_v24  ;;  %4369 = vmatprep.subr.mxu0 %v4779_v46 }
 0x4be   :  { %4362 = vmatmul.mubr.msk.f32.vlgmr.msra.gmra.mrb[6].mxu0 %vm240_vm6, %v571_v25  ;;  %4376 = vmatprep.mubr.msk.f32.mxu1 %vm4780_vm5, %v4779_v46 }
 0x4bf   :  { %4371 = vmatprep.mubr.msk.f32.mxu0 %vm4780_vm5, %v4779_v46 }
 0x58c   :  { %v5031_v26 = vpop.f32.mrb[2].mxu1 }
 0x58d   :  { %v5033_v27 = vpop.f32.mrb[4].mxu0  ;;  %v4358_v28 = vpop.f32.mrb[3].mxu1 }
 0x58e   :  { %v4353_v29 = vpop.f32.mrb[5].mxu0 }
 0x590   :  { %v722_v30 = vpop.f32.mrb[4].mxu1 }
 0x591   :  { %v727_v31 = vmul.f32 0.35355338, %v722_v30  ;;  %v644_v32 = vpop.f32.mrb[6].mxu0  ;;  %v4368_v33 = vpop.f32.mrb[5].mxu1 }
 0x592   :  { %v726_v34 = vmul.f32 0.35355338, %v644_v32  ;;  %v4363_v35 = vpop.f32.mrb[7].mxu0 }
 0x593   :  { %v729_v36 = vadd.f32 %v727_v31, %v4990_v55 }
 0x594   :  { %v728_v37 = vadd.f32 %v726_v34, %v4995_v59 }
 0x595   :  { %v733_v38 = vsel %vm240_vm6, %v729_v36, -inf }
 0x596   :  { %734 = vmax.xlane.f32.xlu1 %v733_v38  ;;  %v730_v39 = vsel %vm240_vm6, %v728_v37, -inf }
 0x597   :  { %731 = vmax.xlane.f32.xlu0 %v730_v39 }
 0x5a7   :  { %828 = vrot.lane.b32.xlu1 %v4967_v49, %s4785_s27 }
 0x5ab   :  { %906 = vrot.lane.b32.xlu1 %v4969_v51, %s4786_s28 }
 0x5ad   :  { %752 = vrot.lane.b32.xlu0 %v4969_v51, %s4785_s27 }
 0x5af   :  { %984 = vrot.lane.b32.xlu1 %v4967_v49, %s4786_s28 }
 0x5b3   :  { %982 = vrot.lane.b32.xlu1 %v4967_v49, %s4787_s6 }
 0x623   :  { %v735_v40 = vpop.xlane.xlu1 %734 }
 0x624   :  { %v737_v41 = vsub.f32 %v729_v36, %v735_v40  ;;  %v732_v42 = vpop.xlane.xlu0 %731 }
 0x625   :  { %v736_v43 = vsub.f32 %v728_v37, %v732_v42 }
 0x626   :  { %v740_v44 = vmul.f32 1.442695, %v737_v41 }
 0x627   :  { %v738_v45 = vmul.f32 1.442695, %v736_v43  ;;  %v829_v47 = vpop.permute.xlu1 %828 }
 0x628   :  { %4683 = vpow2.f32 %v740_v44  ;;  %4375 = vmatpush3.msra.mxu1 %v829_v47  ;;  %v753_v48 = vpop.permute.xlu0 %752 }
 0x629   :  { %4370 = vmatpush3.msra.mxu0 %v753_v48  ;;  %4384 = vmatprep.subr.mxu1 %v4779_v46  ;;  %4685 = vpow2.f32 %v738_v45 }
 0x62a   :  { %4379 = vmatprep.subr.mxu0 %v4779_v46 }
 0x62b   :  { %v907_v58 = vpop.permute.xlu1 %906 }
 0x62f   :  { %v985_v61 = vpop.permute.xlu1 %984 }
 0x632   :  { %v4684_v50 = vpop.eup %4683 }
 0x633   :  { %v745_v52 = vsel %vm240_vm6, %v4684_v50, 0.0  ;;  %v4686_v53 = vpop.eup %4685  ;;  %v983_v3 = vpop.permute.xlu1 %982 }
 0x634   :  { %746 = vadd.xlane.f32.xlu0 %v745_v52  ;;  %v742_v54 = vsel %vm240_vm6, %v4686_v53, 0.0 }
 0x638   :  { %743 = vadd.xlane.f32.xlu0 %v742_v54 }
 0x64e   :  { %904 = vrot.lane.b32.xlu0 %v4969_v51, %s4787_s6 }
 0x6c1   :  { %v747_v56 = vpop.xlane.xlu0 %746 }
 0x6c2   :  { %4687 = vrcp.f32 %v747_v56 }
 0x6c5   :  { %v744_v57 = vpop.xlane.xlu0 %743 }
 0x6c6   :  { %4689 = vrcp.f32 %v744_v57 }
 0x6c9   :  { %v905_v4 = vpop.permute.xlu0 %904 }
 0x6cc   :  { %v4688_v60 = vpop.eup %4687 }
 0x6cd   :  { %v751_v62 = vmul.f32 %v4688_v60, %v4684_v50 }
 0x6cf   :  { %4377 = vmatmul.mubr.msk.f32.vlgmr.msra.gmra.mrb[6].mxu1 %vm240_vm6, %v751_v62 }
 0x6d0   :  { %v4690_v63 = vpop.eup %4689  ;;  %4385 = vmatpush3.xpose.msk.msra.mxu1 %vm240_vm6, %v985_v61  ;;  %4386 = vmatprep.mubr.msk.f32.mxu1 %vm4780_vm5, %v4779_v46 }
 0x6d1   :  { %v750_v2 = vmul.f32 %v4690_v63, %v4686_v53  ;;  %4394 = vmatprep.subr.mxu1 %v4779_v46 }
 0x6d3   :  { %4372 = vmatmul.mubr.msk.f32.vlgmr.msra.gmra.mrb[8].mxu0 %vm240_vm6, %v750_v2  ;;  %4387 = vmatmul.mubr.msk.f32.vlgmr.msra.gmra.mrb[8].mxu1 %vm240_vm6, %v983_v3 }
 0x6d4   :  { %4380 = vmatpush3.xpose.msk.msra.mxu0 %vm240_vm6, %v907_v58  ;;  %4381 = vmatprep.mubr.msk.f32.mxu0 %vm4780_vm5, %v4779_v46 }
 0x6d5   :  { %4389 = vmatprep.subr.mxu0 %v4779_v46  ;;  %4396 = vmatprep.mubr.msk.f32.mxu1 %vm4780_vm5, %v4779_v46 }
 0x6d7   :  { %4382 = vmatmul.mubr.msk.f32.vlgmr.msra.gmra.mrb[10].mxu0 %vm240_vm6, %v905_v4 }
 0x6d8   :  { %4391 = vmatprep.mubr.msk.f32.mxu0 %vm4780_vm5, %v4779_v46 }
 0x7a2   :  { %v5069_v5 = vpop.f32.mrb[6].mxu1 }
 0x7a3   :  { %v4378_v6 = vpop.f32.mrb[7].mxu1 }
 0x7a6   :  { %v5071_v7 = vpop.f32.mrb[8].mxu0  ;;  %v1056_v8 = vpop.f32.mrb[8].mxu1 }
 0x7a7   :  { %v1061_v9 = vmul.f32 0.35355338, %v1056_v8  ;;  %v4373_v10 = vpop.f32.mrb[9].mxu0  ;;  %v4388_v11 = vpop.f32.mrb[9].mxu1 }
 0x7a9   :  { %v1063_v12 = vadd.f32 %v1061_v9, %v4990_v55 }
 0x7aa   :  { %v978_v13 = vpop.f32.mrb[10].mxu0 }
 0x7ab   :  { %v1060_v14 = vmul.f32 0.35355338, %v978_v13  ;;  %v4383_v15 = vpop.f32.mrb[11].mxu0  ;;  %v1067_v16 = vsel %vm240_vm6, %v1063_v12, -inf }
 0x7ac   :  { %1068 = vmax.xlane.f32.xlu1 %v1067_v16 }
 0x7ad   :  { %v1062_v17 = vadd.f32 %v1060_v14, %v4995_v59 }
 0x7af   :  { %v1064_v18 = vsel %vm240_vm6, %v1062_v17, -inf }
 0x7b0   :  { %1065 = vmax.xlane.f32.xlu0 %v1064_v18  ;;  %v1574_v18 = vld [vmem:[%s5526_s8 + $0x10] sm:$0xff] }
 0x7bd   :  { %1162 = vrot.lane.b32.xlu1 %v4967_v49, %s4788_s2 }
 0x7c1   :  { %1240 = vrot.lane.b32.xlu1 %v4969_v51, %s4789_s29 }
 0x7c5   :  { %1318 = vrot.lane.b32.xlu1 %v4967_v49, %s4789_s29 }
 0x7c6   :  { %1086 = vrot.lane.b32.xlu0 %v4969_v51, %s4788_s2 }
 0x7c9   :  { %1316 = vrot.lane.b32.xlu1 %v4967_v49, %s4790_s0 }
 0x839   :  { %v1069_v19 = vpop.xlane.xlu1 %1068 }
 0x83a   :  { %v1071_v20 = vsub.f32 %v1063_v12, %v1069_v19  ;;  %v1573_v12 = vld [vmem:[%s5526_s8 + $0x8] sm:$0xff]  ;;  %v1575_v19 = vld [vmem:[%s5526_s8 + $0x18] sm:$0xff] }
 0x83c   :  { %v1074_v21 = vmul.f32 1.442695, %v1071_v20 }
 0x83d   :  { %v1163_v22 = vpop.permute.xlu1 %1162  ;;  %v1066_v23 = vpop.xlane.xlu0 %1065 }
 0x83e   :  { %4691 = vpow2.f32 %v1074_v21  ;;  %v1070_v24 = vsub.f32 %v1062_v17, %v1066_v23  ;;  %4395 = vmatpush3.msra.mxu1 %v1163_v22 }
 0x83f   :  { %4404 = vmatprep.subr.mxu1 %v4779_v46 }
 0x840   :  { %v1072_v25 = vmul.f32 1.442695, %v1070_v24 }
 0x841   :  { %v1087_v28 = vpop.permute.xlu0 %1086  ;;  %v1241_v35 = vpop.permute.xlu1 %1240 }
 0x842   :  { %4693 = vpow2.f32 %v1072_v25  ;;  %4390 = vmatpush3.msra.mxu0 %v1087_v28 }
 0x843   :  { %4399 = vmatprep.subr.mxu0 %v4779_v46 }
 0x845   :  { %v1319_v37 = vpop.permute.xlu1 %1318 }
 0x848   :  { %v4692_v29 = vpop.eup %4691 }
 0x849   :  { %v1079_v30 = vsel %vm240_vm6, %v4692_v29, 0.0  ;;  %v1317_v41 = vpop.permute.xlu1 %1316 }
 0x84a   :  { %1080 = vadd.xlane.f32.xlu0 %v1079_v30 }
 0x84c   :  { %v4694_v31 = vpop.eup %4693 }
 0x84d   :  { %v1076_v32 = vsel %vm240_vm6, %v4694_v31, 0.0 }
 0x84e   :  { %1077 = vadd.xlane.f32.xlu0 %v1076_v32 }
 0x864   :  { %1238 = vrot.lane.b32.xlu0 %v4969_v51, %s4790_s0 }
 0x8d7   :  { %v1081_v33 = vpop.xlane.xlu0 %1080 }
 0x8d8   :  { %4695 = vrcp.f32 %v1081_v33 }
 0x8db   :  { %v1078_v34 = vpop.xlane.xlu0 %1077 }
 0x8dc   :  { %4697 = vrcp.f32 %v1078_v34 }
 0x8df   :  { %v1239_v42 = vpop.permute.xlu0 %1238 }
 0x8e2   :  { %v4696_v36 = vpop.eup %4695 }
 0x8e3   :  { %v1085_v38 = vmul.f32 %v4696_v36, %v4692_v29 }
 0x8e5   :  { %4397 = vmatmul.mubr.msk.f32.vlgmr.msra.gmra.mrb[10].mxu1 %vm240_vm6, %v1085_v38 }
 0x8e6   :  { %v4698_v39 = vpop.eup %4697  ;;  %4405 = vmatpush3.xpose.msk.msra.mxu1 %vm240_vm6, %v1319_v37  ;;  %4406 = vmatprep.mubr.msk.f32.mxu1 %vm4780_vm5, %v4779_v46 }
 0x8e7   :  { %v1084_v40 = vmul.f32 %v4698_v39, %v4694_v31  ;;  %4414 = vmatprep.subr.mxu1 %v4779_v46  ;;  %v1973_v39 = vld [vmem:[%s5492_s12] sm:$0xff] }
 0x8e9   :  { %4392 = vmatmul.mubr.msk.f32.vlgmr.msra.gmra.mrb[12].mxu0 %vm240_vm6, %v1084_v40  ;;  %4407 = vmatmul.mubr.msk.f32.vlgmr.msra.gmra.mrb[12].mxu1 %vm240_vm6, %v1317_v41  ;;  %v1974_v40 = vld [vmem:[%s5492_s12 + $0x8] sm:$0xff]  ;;  %v1975_v41 = vld [vmem:[%s5492_s12 + $0x10] sm:$0xff] }
 0x8ea   :  { %4400 = vmatpush3.xpose.msk.msra.mxu0 %vm240_vm6, %v1241_v35  ;;  %4401 = vmatprep.mubr.msk.f32.mxu0 %vm4780_vm5, %v4779_v46 }
 0x8eb   :  { %4409 = vmatprep.subr.mxu0 %v4779_v46  ;;  %4416 = vmatprep.mubr.msk.f32.mxu1 %vm4780_vm5, %v4779_v46 }
 0x8ed   :  { %4402 = vmatmul.mubr.msk.f32.vlgmr.msra.gmra.mrb[14].mxu0 %vm240_vm6, %v1239_v42  ;;  %v4599_v42 = vpack.c.bf16 %v1974_v40, %v1973_v39 }
 0x8ee   :  { %4411 = vmatprep.mubr.msk.f32.mxu0 %vm4780_vm5, %v4779_v46 }
 0x9b8   :  { %v5107_v43 = vpop.f32.mrb[10].mxu1 }
 0x9b9   :  { %v4398_v44 = vpop.f32.mrb[11].mxu1 }
 0x9bc   :  { %v1158_v45 = vpop.f32.mrb[12].mxu0  ;;  %v1390_v47 = vpop.f32.mrb[12].mxu1 }
 0x9bd   :  { %v1395_v48 = vmul.f32 0.35355338, %v1390_v47  ;;  %v4393_v50 = vpop.f32.mrb[13].mxu0  ;;  %v4408_v52 = vpop.f32.mrb[13].mxu1  ;;  %v2066_v47 = vld [vmem:[%s5494_s14 + $0x8] sm:$0xff] }
 0x9bf   :  { %v1397_v53 = vadd.f32 %v1395_v48, %v4990_v55 }
 0x9c0   :  { %v1312_v54 = vpop.f32.mrb[14].mxu0 }
 0x9c1   :  { %v1394_v56 = vmul.f32 0.35355338, %v1312_v54  ;;  %v4403_v57 = vpop.f32.mrb[15].mxu0  ;;  %v1401_v58 = vsel %vm240_vm6, %v1397_v53, -inf }
 0x9c2   :  { %1402 = vmax.xlane.f32.xlu1 %v1401_v58 }
 0x9c3   :  { %v1396_v60 = vadd.f32 %v1394_v56, %v4995_v59 }
 0x9c5   :  { %v1398_v61 = vsel %vm240_vm6, %v1396_v60, -inf }
 0x9c6   :  { %1399 = vmax.xlane.f32.xlu0 %v1398_v61 }
 0x9d3   :  { %1496 = vrot.lane.b32.xlu1 %v4967_v49, %s4791_s30 }
 0xa4f   :  { %v1403_v62 = vpop.xlane.xlu1 %1402 }
 0xa50   :  { %v1405_v63 = vsub.f32 %v1397_v53, %v1403_v62 }
 0xa52   :  { %v1408_v2 = vmul.f32 1.442695, %v1405_v63 }
 0xa53   :  { %v1497_v3 = vpop.permute.xlu1 %1496  ;;  %v1400_v4 = vpop.xlane.xlu0 %1399 }
 0xa54   :  { %4699 = vpow2.f32 %v1408_v2  ;;  %v1404_v55 = vsub.f32 %v1396_v60, %v1400_v4  ;;  %4415 = vmatpush3.msra.mxu1 %v1497_v3 }
 0xa55   :  { %4600 = vmatprep.subr.bf16.mxu1 %v4599_v42 }
 0xa56   :  { %v1406_v6 = vmul.f32 1.442695, %v1404_v55 }
 0xa58   :  { %4701 = vpow2.f32 %v1406_v6 }
 0xa5e   :  { %v4700_v8 = vpop.eup %4699 }
 0xa5f   :  { %v1413_v9 = vsel %vm240_vm6, %v4700_v8, 0.0 }
 0xa60   :  { %1414 = vadd.xlane.f32.xlu0 %v1413_v9 }
 0xa62   :  { %v4702_v59 = vpop.eup %4701 }
 0xa63   :  { %v1410_v10 = vsel %vm240_vm6, %v4702_v59, 0.0 }
 0xa64   :  { %1411 = vadd.xlane.f32.xlu0 %v1410_v10 }
 0xa7a   :  { %1420 = vrot.lane.b32.xlu0 %v4969_v51, %s4791_s30  ;;  %v1572_v51 = vld [vmem:[%s5526_s8] sm:$0xff] }
 0xaed   :  { %v1415_v49 = vpop.xlane.xlu0 %1414 }
 0xaee   :  { %4703 = vrcp.f32 %v1415_v49 }
 0xaf1   :  { %v1412_v11 = vpop.xlane.xlu0 %1411 }
 0xaf2   :  { %4705 = vrcp.f32 %v1412_v11  ;;  %v4156_v11 = vld [vmem:[%s5491_s11] ss:$0 sm:$0xff] }
 0xaf5   :  { %v1421_v13 = vpop.permute.xlu0 %1420 }
 0xaf6   :  { %4410 = vmatpush3.msra.mxu0 %v1421_v13 }
 0xaf7   :  { %4419 = vmatprep.subr.mxu0 %v1573_v12 }
 0xaf8   :  { %v4704_v14 = vpop.eup %4703 }
 0xaf9   :  { %v1419_v15 = vmul.f32 %v4704_v14, %v4700_v8  ;;  %v4155_v8 = vld [vmem:[%s5490_s10] ss:$0 sm:$0xff]  ;;  %v2067_v14 = vld [vmem:[%s5494_s14 + $0x10] sm:$0xff] }
 0xafb   :  { %4417 = vmatmul.mubr.msk.f32.vlgmr.msra.gmra.mrb[14].mxu1 %vm240_vm6, %v1419_v15  ;;  %v2068_v15 = vld [vmem:[%s5494_s14 + $0x18] sm:$0xff] }
 0xafc   :  { %v4706_v16 = vpop.eup %4705  ;;  %4602 = vmatpush3.bf16.msra.mxu1 %v4599_v42 }
 0xafd   :  { %v1418_v17 = vmul.f32 %v4706_v16, %v4702_v59 }
 0xaff   :  { %4412 = vmatmul.mubr.msk.f32.vlgmr.msra.gmra.mrb[16].mxu0 %vm240_vm6, %v1418_v17 }
 0xb00   :  { %4421 = vmatprep.mubr.msk.f32.mxu0 %vm240_vm6, %v5071_v7  ;;  %4420 = vmatpush3.msra.mxu0 %v1573_v12 }
 0xb01   :  { %4424 = vmatprep.subr.mxu0 %v1572_v51 }
 0xb03   :  { %4422 = vmatmul.mubr.msk.f32.vlgmr.msra.gmra.mrb[18].mxu0 %vm240_vm6, %v5069_v5 }
 0xb04   :  { %4426 = vmatprep.mubr.msk.f32.mxu0 %vm240_vm6, %v5033_v27  ;;  %4425 = vmatpush3.msra.mxu0 %v1572_v51  ;;  %v4611_v51 = vpack.c.bf16 %v2068_v15, %v2067_v14 }
 0xb05   :  { %4429 = vmatprep.subr.mxu0 %v1574_v18 }
 0xb0b   :  { %4427 = vmatmul.mubr.msk.f32.vlgmr.msra.gmra.mrb[18].mxu0 %vm240_vm6, %v5031_v26  ;;  %v4154_v26 = vld [vmem:[%s5489_s9] ss:$0 sm:$0xff] }
 0xb0c   :  { %4431 = vmatprep.mubr.msk.f32.mxu0 %vm240_vm6, %v1158_v45  ;;  %4430 = vmatpush3.msra.mxu0 %v1574_v18  ;;  %v2065_v45 = vld [vmem:[%s5494_s14] sm:$0xff] }
 0xb0d   :  { %4434 = vmatprep.subr.mxu0 %v1575_v19  ;;  %v4607_v48 = vpack.c.bf16 %v2066_v47, %v2065_v45  ;;  %v80_v18 = vld [vmem:[%s5527_s1] sm:$0xff] }
 0xb13   :  { %4432 = vmatmul.mubr.msk.f32.vlgmr.msra.gmra.mrb[18].mxu0 %vm240_vm6, %v5107_v43  ;;  %v1976_v43 = vld [vmem:[%s5492_s12 + $0x18] sm:$0xff] }
 0xb14   :  { %4435 = vmatpush3.msra.mxu0 %v1575_v19  ;;  %v4603_v44 = vpack.c.bf16 %v1976_v43, %v1975_v41  ;;  %v81_v19 = vld [vmem:[%s5527_s1 + $0x8] sm:$0xff] }
 0xb15   :  { %4461 = vmatprep.subr.mxu0 %v4779_v46 }
 0xb16   :  { %4604 = vmatprep.subr.bf16.mxu1 %v4603_v44 }
 0xb17   :  { %4606 = vmatpush3.bf16.msra.mxu1 %v4603_v44 }
 0xb18   :  { %4608 = vmatprep.subr.bf16.mxu1 %v4607_v48 }
 0xbce   :  { %v1568_v27 = vpop.f32.mrb[14].mxu1 }
 0xbcf   :  { %v4418_v5 = vpop.f32.mrb[15].mxu1 }
 0xbd2   :  { %v1492_v7 = vpop.f32.mrb[16].mxu0 }
 0xbd3   :  { %v4413_v20 = vpop.f32.mrb[17].mxu0  ;;  %4436 = vmatprep.mubr.msk.f32.mxu0 %vm240_vm6, %v1492_v7  ;;  %v4160_v7 = vld [vmem:[%s5495_s15] ss:$0 sm:$0xff] }
 0xbd4   :  { %4437 = vmatmul.mubr.msk.f32.vlgmr.msra.gmra.mrb[18].mxu0 %vm240_vm6, %v1568_v27 }
 0xbd5   :  { %4463 = vmatprep.mubr.msk.f32.mxu0 %vm4780_vm5, %v4779_v46 }
 0xca7   :  { %v4438_v21 = vpop.f32.mrb[18].mxu0 }
 0xca8   :  { %v1912_v22 = vadd.f32 %v4438_v21, %v4154_v26  ;;  %v1894_v23 = vpop.f32.mrb[19].mxu0 }
 0xca9   :  { %v1911_v24 = vadd.f32 %v4154_v26, %v1894_v23  ;;  %v4157_v26 = vld [vmem:[%s5493_s13] ss:$0 sm:$0xff] }
 0xcaa   :  { %v5151_v25 = vadd.f32 %v1912_v22, %v4928_v1 }
 0xcab   :  { %v5154_v28 = vadd.f32 %v1911_v24, %v4923_v0 }
 0xcac   :  { %v1920_v29 = vsel %vm84_vm0, %v5151_v25, 0.0 }
 0xcad   :  { %1921 = vadd.xlane.f32.xlu0 %v1920_v29  ;;  %v1917_v30 = vsel %vm84_vm0, %v5154_v28, 0.0 }
 0xcae   :  { %1918 = vadd.xlane.f32.xlu1 %v1917_v30 }
 0xd3a   :  { %v1922_v31 = vpop.xlane.xlu0 %1921 }
 0xd3b   :  { %v1924_v32 = vmul.f32 0.03125, %v1922_v31  ;;  %v1919_v33 = vpop.xlane.xlu1 %1918  ;;  %v5238_v31 = vld [vmem:[%s5528_s3 + $0x1] ss:$0 sm:$0xff] }
 0xd3c   :  { %v1923_v34 = vmul.f32 0.03125, %v1919_v33 }
 0xd3d   :  { %v1926_v35 = vsub.f32 %v5151_v25, %v1924_v32 }
 0xd3e   :  { %v1925_v1 = vsub.f32 %v5154_v28, %v1923_v34 }
 0xd3f   :  { %v1928_v36 = vmul.f32 %v1926_v35, %v1926_v35  ;;  %v1962_v9 = vmul.f32 %v4155_v8, %v1926_v35  ;;  %v5243_v35 = vld [vmem:[%s5528_s3] ss:$0 sm:$0xff] }
 0xd40   :  { %v1927_v37 = vmul.f32 %v1925_v1, %v1925_v1  ;;  %v1961_v10 = vmul.f32 %v4155_v8, %v1925_v1 }
 0xd41   :  { %v1932_v0 = vsel %vm84_vm0, %v1928_v36, 0.0 }
 0xd42   :  { %1933 = vadd.xlane.f32.xlu1 %v1932_v0  ;;  %v1929_v38 = vsel %vm84_vm0, %v1927_v37, 0.0 }
 0xd43   :  { %1930 = vadd.xlane.f32.xlu0 %v1929_v38 }
 0xdcf   :  { %v1934_v50 = vpop.xlane.xlu1 %1933 }
 0xdd0   :  { %v1936_v52 = vmul.f32 0.032258064, %v1934_v50  ;;  %v1931_v53 = vpop.xlane.xlu0 %1930 }
 0xdd1   :  { %v1935_v54 = vmul.f32 0.032258064, %v1931_v53 }
 0xdd2   :  { %4707 = vrsqrt.f32 %v1936_v52  ;;  %vm1946_vm7 = vcmp.eq.f32.partialorder %v1936_v52, inf  ;;  %v1949_v60 = vand.u32 2147483648, %v1936_v52  ;;  %vm1948_vm8 = vcmp.eq.f32.partialorder %v1936_v52, 0.0 }
 0xdd3   :  { %4709 = vrsqrt.f32 %v1935_v54  ;;  %vm1939_vm9 = vcmp.eq.f32.partialorder %v1935_v54, inf  ;;  %v1942_v63 = vand.u32 2147483648, %v1935_v54  ;;  %vm1941_vm10 = vcmp.eq.f32.partialorder %v1935_v54, 0.0 }
 0xddc   :  { %v4708_v56 = vpop.eup %4707 }
 0xddd   :  { %v4710_v57 = vpop.eup %4709  ;;  %v1945_v58 = vmul.f32 %v4708_v56, %v1936_v52 }
 0xdde   :  { %v1938_v61 = vmul.f32 %v4710_v57, %v1935_v54 }
 0xddf   :  { %v1947_v62 = vsel %vm1946_vm7, %v1936_v52, %v1945_v58 }
 0xde0   :  { %v1950_v2 = vsel %vm1948_vm8, %v1949_v60, %v1947_v62  ;;  %v1940_v3 = vsel %vm1939_vm9, %v1935_v54, %v1938_v61 }
 0xde1   :  { %v1952_v4 = vadd.f32 1e-06, %v1950_v2  ;;  %v1943_v55 = vsel %vm1941_vm10, %v1942_v63, %v1940_v3 }
 0xde2   :  { %v1951_v6 = vadd.f32 1e-06, %v1943_v55 }
 0xde3   :  { %4711 = vrcp.f32 %v1952_v4 }
 0xde4   :  { %4713 = vrcp.f32 %v1951_v6 }
 0xded   :  { %v4712_v59 = vpop.eup %4711 }
 0xdee   :  { %v4714_v49 = vpop.eup %4713  ;;  %v1964_v12 = vmul.f32 %v4712_v59, %v1962_v9 }
 0xdef   :  { %v1963_v13 = vmul.f32 %v4714_v49, %v1961_v10 }
 0xdf0   :  { %v1972_v17 = vadd.f32 %v4156_v11, %v1964_v12 }
 0xdf1   :  { %v1971_v16 = vadd.f32 %v4156_v11, %v1963_v13 }
 0xdf3   :  { %4447 = vmatprep.mubr.msk.f32.mxu1 %vm84_vm0, %v1971_v16 }
 0xdf4   :  { %4448 = vmatmul.mubr.msk.f32.vlgmr.msra.gmra.mrb[16].mxu1 %vm84_vm0, %v1972_v17 }
 0xdf5   :  { %4610 = vmatpush3.bf16.msra.mxu1 %v4607_v48  ;;  %4458 = vmatprep.mubr.msk.f32.mxu1 %vm84_vm0, %v80_v18 }
 0xdf6   :  { %4612 = vmatprep.subr.bf16.mxu1 %v4611_v51 }
 0xdf9   :  { %4614 = vmatpush3.bf16.msra.mxu1 %v4611_v51 }
 0xdfa   :  { %4466 = vmatprep.subr.mxu1 %v4779_v46 }
 0xdfc   :  { %4459 = vmatmul.mubr.msk.f32.vlgmr.msra.gmra.mrb[18].mxu1 %vm84_vm0, %v81_v19 }
 0xdfd   :  { %4468 = vmatprep.mubr.msk.f32.mxu1 %vm4780_vm5, %v4779_v46 }
 0xec7   :  { %v4449_v27 = vpop.f32.mrb[16].mxu1 }
 0xec8   :  { %v2056_v5 = vpop.f32.mrb[17].mxu1  ;;  %v5219_v24 = vadd.f32 %v4449_v27, %v4157_v26 }
 0xec9   :  { %v5224_v29 = vadd.f32 %v4157_v26, %v2056_v5 }
 0xecf   :  { %v4460_v20 = vpop.f32.mrb[18].mxu1 }
 0xed0   :  { %v5213_v21 = vadd.f32 %v4460_v20, %v4160_v7  ;;  %v2148_v22 = vpop.f32.mrb[19].mxu1 }
 0xed1   :  { %v5215_v23 = vadd.f32 %v4160_v7, %v2148_v22 }
 0xed2   :  { %4467 = vmatpush3.xpose.msk.msra.mxu1 %vm240_vm6, %v5213_v21 }
 0xed3   :  { %4462 = vmatpush3.xpose.msk.msra.mxu0 %vm240_vm6, %v5215_v23  ;;  %4476 = vmatprep.subr.mxu1 %v4779_v46 }
 0xed4   :  { %4471 = vmatprep.subr.mxu0 %v4779_v46 }
 0xed5   :  { %4469 = vmatmul.mubr.msk.f32.vlgmr.msra.gmra.mrb[20].mxu1 %vm240_vm6, %v5219_v24 }
 0xed6   :  { %4464 = vmatmul.mubr.msk.f32.vlgmr.msra.gmra.mrb[20].mxu0 %vm240_vm6, %v5224_v29  ;;  %4478 = vmatprep.mubr.msk.f32.mxu1 %vm4780_vm5, %v4779_v46 }
 0xed7   :  { %4473 = vmatprep.mubr.msk.f32.mxu0 %vm4780_vm5, %v4779_v46 }
 0xfa8   :  { %v2307_v30 = vpop.f32.mrb[20].mxu1 }
 0xfa9   :  { %v2312_v32 = vmul.f32 0.35355338, %v2307_v30  ;;  %v2231_v33 = vpop.f32.mrb[20].mxu0  ;;  %v4470_v34 = vpop.f32.mrb[21].mxu1 }
 0xfaa   :  { %v2311_v1 = vmul.f32 0.35355338, %v2231_v33  ;;  %v4465_v36 = vpop.f32.mrb[21].mxu0 }
 0xfab   :  { %v2326_v37 = vadd.f32 %v5238_v31, %v2312_v32 }
 0xfac   :  { %v2325_v0 = vadd.f32 %v5243_v35, %v2311_v1 }
 0xfad   :  { %v2330_v38 = vsel %vm240_vm6, %v2326_v37, -inf }
 0xfae   :  { %2331 = vmax.xlane.f32.xlu1 %v2330_v38  ;;  %v2327_v39 = vsel %vm240_vm6, %v2325_v0, -inf }
 0xfaf   :  { %2328 = vmax.xlane.f32.xlu0 %v2327_v39 }
 0xfbf   :  { %2425 = vrot.lane.b32.xlu1 %v5213_v21, %s4781_s7 }
 0xfc3   :  { %2503 = vrot.lane.b32.xlu1 %v5215_v23, %s4784_s26 }
 0xfc5   :  { %2349 = vrot.lane.b32.xlu0 %v5215_v23, %s4781_s7 }
 0xfc7   :  { %2581 = vrot.lane.b32.xlu1 %v5213_v21, %s4784_s26 }
0x103b   :  { %v2332_v40 = vpop.xlane.xlu1 %2331 }
0x103c   :  { %v2334_v41 = vsub.f32 %v2326_v37, %v2332_v40  ;;  %v2329_v42 = vpop.xlane.xlu0 %2328 }
0x103d   :  { %v2333_v43 = vsub.f32 %v2325_v0, %v2329_v42 }
0x103e   :  { %v2337_v44 = vmul.f32 1.442695, %v2334_v41 }
0x103f   :  { %v2335_v45 = vmul.f32 1.442695, %v2333_v43  ;;  %v2426_v47 = vpop.permute.xlu1 %2425 }
0x1040   :  { %4715 = vpow2.f32 %v2337_v44  ;;  %4477 = vmatpush3.msra.mxu1 %v2426_v47  ;;  %v2350_v48 = vpop.permute.xlu0 %2349 }
0x1041   :  { %4717 = vpow2.f32 %v2335_v45  ;;  %4472 = vmatpush3.msra.mxu0 %v2350_v48  ;;  %4486 = vmatprep.subr.mxu1 %v4779_v46 }
0x1042   :  { %4481 = vmatprep.subr.mxu0 %v4779_v46 }
0x1043   :  { %v2504_v56 = vpop.permute.xlu1 %2503 }
0x1047   :  { %v2582_v57 = vpop.permute.xlu1 %2581 }
0x104a   :  { %v4716_v50 = vpop.eup %4715 }
0x104b   :  { %v4718_v52 = vpop.eup %4717  ;;  %v2342_v53 = vsel %vm240_vm6, %v4716_v50, 0.0 }
0x104c   :  { %2343 = vadd.xlane.f32.xlu1 %v2342_v53  ;;  %v2339_v54 = vsel %vm240_vm6, %v4718_v52, 0.0 }
0x104d   :  { %2340 = vadd.xlane.f32.xlu0 %v2339_v54 }
0x105d   :  { %2579 = vrot.lane.b32.xlu1 %v5219_v24, %s4784_s26 }
0x1063   :  { %2501 = vrot.lane.b32.xlu0 %v5224_v29, %s4784_s26 }
0x10d9   :  { %v2344_v58 = vpop.xlane.xlu1 %2343 }
0x10da   :  { %4719 = vrcp.f32 %v2344_v58  ;;  %v2341_v60 = vpop.xlane.xlu0 %2340 }
0x10db   :  { %4721 = vrcp.f32 %v2341_v60 }
0x10dd   :  { %v2580_v3 = vpop.permute.xlu1 %2579 }
0x10de   :  { %v2502_v4 = vpop.permute.xlu0 %2501 }
0x10e4   :  { %v4720_v61 = vpop.eup %4719 }
0x10e5   :  { %v4722_v62 = vpop.eup %4721  ;;  %v2348_v63 = vmul.f32 %v4720_v61, %v4716_v50 }
0x10e6   :  { %v2347_v2 = vmul.f32 %v4722_v62, %v4718_v52 }
0x10e7   :  { %4479 = vmatmul.mubr.msk.f32.vlgmr.msra.gmra.mrb[22].mxu1 %vm240_vm6, %v2348_v63 }
0x10e8   :  { %4487 = vmatpush3.xpose.msk.msra.mxu1 %vm240_vm6, %v2582_v57  ;;  %4474 = vmatmul.mubr.msk.f32.vlgmr.msra.gmra.mrb[22].mxu0 %vm240_vm6, %v2347_v2 }
0x10e9   :  { %4482 = vmatpush3.xpose.msk.msra.mxu0 %vm240_vm6, %v2504_v56  ;;  %4488 = vmatprep.mubr.msk.f32.mxu1 %vm4780_vm5, %v4779_v46 }
0x10ea   :  { %4483 = vmatprep.mubr.msk.f32.mxu0 %vm4780_vm5, %v4779_v46  ;;  %4496 = vmatprep.subr.mxu1 %v4779_v46 }
0x10eb   :  { %4489 = vmatmul.mubr.msk.f32.vlgmr.msra.gmra.mrb[24].mxu1 %vm240_vm6, %v2580_v3  ;;  %4491 = vmatprep.subr.mxu0 %v4779_v46 }
0x10ec   :  { %4484 = vmatmul.mubr.msk.f32.vlgmr.msra.gmra.mrb[24].mxu0 %vm240_vm6, %v2502_v4  ;;  %4498 = vmatprep.mubr.msk.f32.mxu1 %vm4780_vm5, %v4779_v46 }
0x10ed   :  { %4493 = vmatprep.mubr.msk.f32.mxu0 %vm4780_vm5, %v4779_v46 }
0x11ba   :  { %v5281_v55 = vpop.f32.mrb[22].mxu1 }
0x11bb   :  { %v5283_v6 = vpop.f32.mrb[22].mxu0  ;;  %v4480_v8 = vpop.f32.mrb[23].mxu1 }
0x11bc   :  { %v4475_v9 = vpop.f32.mrb[23].mxu0 }
0x11be   :  { %v2653_v59 = vpop.f32.mrb[24].mxu1 }
0x11bf   :  { %v2658_v10 = vmul.f32 0.35355338, %v2653_v59  ;;  %v2575_v49 = vpop.f32.mrb[24].mxu0  ;;  %v4490_v11 = vpop.f32.mrb[25].mxu1 }
0x11c0   :  { %v2657_v12 = vmul.f32 0.35355338, %v2575_v49  ;;  %v4485_v13 = vpop.f32.mrb[25].mxu0 }
0x11c1   :  { %v2660_v14 = vadd.f32 %v5238_v31, %v2658_v10 }
0x11c2   :  { %v2659_v15 = vadd.f32 %v5243_v35, %v2657_v12 }
0x11c3   :  { %v2664_v16 = vsel %vm240_vm6, %v2660_v14, -inf }
0x11c4   :  { %2665 = vmax.xlane.f32.xlu1 %v2664_v16  ;;  %v2661_v17 = vsel %vm240_vm6, %v2659_v15, -inf }
0x11c5   :  { %2662 = vmax.xlane.f32.xlu0 %v2661_v17 }
0x11d5   :  { %2759 = vrot.lane.b32.xlu1 %v5213_v21, %s4783_s5 }
0x11d9   :  { %2837 = vrot.lane.b32.xlu1 %v5215_v23, %s4787_s6 }
0x11db   :  { %2683 = vrot.lane.b32.xlu0 %v5215_v23, %s4783_s5 }
0x11dd   :  { %2915 = vrot.lane.b32.xlu1 %v5213_v21, %s4787_s6 }
0x11e1   :  { %2913 = vrot.lane.b32.xlu1 %v5219_v24, %s4787_s6 }
0x1251   :  { %v2666_v51 = vpop.xlane.xlu1 %2665 }
0x1252   :  { %v2668_v18 = vsub.f32 %v2660_v14, %v2666_v51  ;;  %v2663_v19 = vpop.xlane.xlu0 %2662 }
0x1253   :  { %v2667_v27 = vsub.f32 %v2659_v15, %v2663_v19 }
0x1254   :  { %v2671_v5 = vmul.f32 1.442695, %v2668_v18 }
0x1255   :  { %v2669_v7 = vmul.f32 1.442695, %v2667_v27  ;;  %v2760_v20 = vpop.permute.xlu1 %2759 }
0x1256   :  { %4723 = vpow2.f32 %v2671_v5  ;;  %4497 = vmatpush3.msra.mxu1 %v2760_v20  ;;  %v2684_v26 = vpop.permute.xlu0 %2683 }
0x1257   :  { %4492 = vmatpush3.msra.mxu0 %v2684_v26  ;;  %4506 = vmatprep.subr.mxu1 %v4779_v46  ;;  %4725 = vpow2.f32 %v2669_v7 }
0x1258   :  { %4501 = vmatprep.subr.mxu0 %v4779_v46 }
0x1259   :  { %v2838_v36 = vpop.permute.xlu1 %2837 }
0x125d   :  { %v2916_v0 = vpop.permute.xlu1 %2915 }
0x1260   :  { %v4724_v22 = vpop.eup %4723 }
0x1261   :  { %v2676_v30 = vsel %vm240_vm6, %v4724_v22, 0.0  ;;  %v4726_v32 = vpop.eup %4725  ;;  %v2914_v41 = vpop.permute.xlu1 %2913 }
0x1262   :  { %2677 = vadd.xlane.f32.xlu0 %v2676_v30  ;;  %v2673_v33 = vsel %vm240_vm6, %v4726_v32, 0.0 }
0x1266   :  { %2674 = vadd.xlane.f32.xlu0 %v2673_v33 }
0x127c   :  { %2835 = vrot.lane.b32.xlu0 %v5224_v29, %s4787_s6 }
0x12ef   :  { %v2678_v34 = vpop.xlane.xlu0 %2677 }
0x12f0   :  { %4727 = vrcp.f32 %v2678_v34 }
0x12f3   :  { %v2675_v1 = vpop.xlane.xlu0 %2674 }
0x12f4   :  { %4729 = vrcp.f32 %v2675_v1 }
0x12f7   :  { %v2836_v42 = vpop.permute.xlu0 %2835 }
0x12fa   :  { %v4728_v37 = vpop.eup %4727 }
0x12fb   :  { %v2682_v38 = vmul.f32 %v4728_v37, %v4724_v22 }
0x12fd   :  { %4499 = vmatmul.mubr.msk.f32.vlgmr.msra.gmra.mrb[26].mxu1 %vm240_vm6, %v2682_v38 }
0x12fe   :  { %v4730_v39 = vpop.eup %4729  ;;  %4507 = vmatpush3.xpose.msk.msra.mxu1 %vm240_vm6, %v2916_v0  ;;  %4508 = vmatprep.mubr.msk.f32.mxu1 %vm4780_vm5, %v4779_v46 }
0x12ff   :  { %v2681_v40 = vmul.f32 %v4730_v39, %v4726_v32  ;;  %4516 = vmatprep.subr.mxu1 %v4779_v46 }
0x1301   :  { %4494 = vmatmul.mubr.msk.f32.vlgmr.msra.gmra.mrb[26].mxu0 %vm240_vm6, %v2681_v40  ;;  %4509 = vmatmul.mubr.msk.f32.vlgmr.msra.gmra.mrb[28].mxu1 %vm240_vm6, %v2914_v41 }
0x1302   :  { %4502 = vmatpush3.xpose.msk.msra.mxu0 %vm240_vm6, %v2838_v36  ;;  %4503 = vmatprep.mubr.msk.f32.mxu0 %vm4780_vm5, %v4779_v46 }
0x1303   :  { %4511 = vmatprep.subr.mxu0 %v4779_v46  ;;  %4518 = vmatprep.mubr.msk.f32.mxu1 %vm4780_vm5, %v4779_v46 }
0x1305   :  { %4504 = vmatmul.mubr.msk.f32.vlgmr.msra.gmra.mrb[28].mxu0 %vm240_vm6, %v2836_v42 }
0x1306   :  { %4513 = vmatprep.mubr.msk.f32.mxu0 %vm4780_vm5, %v4779_v46 }
0x13d0   :  { %v5321_v43 = vpop.f32.mrb[26].mxu1 }
0x13d1   :  { %v4500_v44 = vpop.f32.mrb[27].mxu1 }
0x13d4   :  { %v5323_v45 = vpop.f32.mrb[26].mxu0  ;;  %v2987_v47 = vpop.f32.mrb[28].mxu1 }
0x13d5   :  { %v2992_v48 = vmul.f32 0.35355338, %v2987_v47  ;;  %v4495_v50 = vpop.f32.mrb[27].mxu0  ;;  %v4510_v52 = vpop.f32.mrb[29].mxu1 }
0x13d6   :  { %v3504_v52 = vld [vmem:[%s5496_s16 + $0x8] sm:$0xff] }
0x13d7   :  { %v2994_v53 = vadd.f32 %v5238_v31, %v2992_v48 }
0x13d8   :  { %v2909_v54 = vpop.f32.mrb[28].mxu0 }
0x13d9   :  { %v2991_v56 = vmul.f32 0.35355338, %v2909_v54  ;;  %v4505_v57 = vpop.f32.mrb[29].mxu0  ;;  %v2998_v58 = vsel %vm240_vm6, %v2994_v53, -inf }
0x13da   :  { %2999 = vmax.xlane.f32.xlu1 %v2998_v58 }
0x13db   :  { %v2993_v60 = vadd.f32 %v5243_v35, %v2991_v56 }
0x13dd   :  { %v2995_v61 = vsel %vm240_vm6, %v2993_v60, -inf }
0x13de   :  { %2996 = vmax.xlane.f32.xlu0 %v2995_v61  ;;  %v3506_v61 = vld [vmem:[%s5496_s16 + $0x18] sm:$0xff] }
0x13eb   :  { %3093 = vrot.lane.b32.xlu1 %v5213_v21, %s4786_s28 }
0x13ef   :  { %3171 = vrot.lane.b32.xlu1 %v5215_v23, %s4790_s0 }
0x13f3   :  { %3249 = vrot.lane.b32.xlu1 %v5213_v21, %s4790_s0 }
0x13f4   :  { %3017 = vrot.lane.b32.xlu0 %v5215_v23, %s4786_s28 }
0x13f7   :  { %3247 = vrot.lane.b32.xlu1 %v5219_v24, %s4790_s0 }
0x1467   :  { %v3000_v62 = vpop.xlane.xlu1 %2999 }
0x1468   :  { %v3002_v63 = vsub.f32 %v2994_v53, %v3000_v62 }
0x146a   :  { %v3005_v2 = vmul.f32 1.442695, %v3002_v63  ;;  %v4197_v63 = vld [vmem:[%s5497_s17] ss:$0 sm:$0xff] }
0x146b   :  { %v3094_v3 = vpop.permute.xlu1 %3093  ;;  %v2997_v4 = vpop.xlane.xlu0 %2996 }
0x146c   :  { %4731 = vpow2.f32 %v3005_v2  ;;  %v3001_v8 = vsub.f32 %v2993_v60, %v2997_v4  ;;  %4517 = vmatpush3.msra.mxu1 %v3094_v3  ;;  %v3505_v60 = vld [vmem:[%s5496_s16 + $0x10] sm:$0xff] }
0x146d   :  { %4526 = vmatprep.subr.mxu1 %v4779_v46 }
0x146e   :  { %v3003_v9 = vmul.f32 1.442695, %v3001_v8 }
0x146f   :  { %v3018_v59 = vpop.permute.xlu0 %3017  ;;  %v3172_v14 = vpop.permute.xlu1 %3171 }
0x1470   :  { %4733 = vpow2.f32 %v3003_v9  ;;  %4512 = vmatpush3.msra.mxu0 %v3018_v59 }
0x1471   :  { %4521 = vmatprep.subr.mxu0 %v4779_v46 }
0x1473   :  { %v3250_v16 = vpop.permute.xlu1 %3249 }
0x1476   :  { %v4732_v10 = vpop.eup %4731 }
0x1477   :  { %v3010_v49 = vsel %vm240_vm6, %v4732_v10, 0.0 }
0x1478   :  { %3011 = vadd.xlane.f32.xlu0 %v3010_v49 }
0x147a   :  { %v4734_v24 = vpop.eup %4733 }
0x147b   :  { %v3007_v11 = vsel %vm240_vm6, %v4734_v24, 0.0 }
0x147c   :  { %3008 = vadd.xlane.f32.xlu0 %v3007_v11 }
0x1492   :  { %3169 = vrot.lane.b32.xlu0 %v5224_v29, %s4790_s0  ;;  %v3248_v29 = vpop.permute.xlu1 %3247 }
0x1505   :  { %v3012_v12 = vpop.xlane.xlu0 %3011 }
0x1506   :  { %4735 = vrcp.f32 %v3012_v12 }
0x1509   :  { %v3009_v13 = vpop.xlane.xlu0 %3008 }
0x150a   :  { %4737 = vrcp.f32 %v3009_v13 }
0x150d   :  { %v3170_v19 = vpop.permute.xlu0 %3169 }
0x1510   :  { %v4736_v15 = vpop.eup %4735 }
0x1511   :  { %v3016_v17 = vmul.f32 %v4736_v15, %v4732_v10 }
0x1513   :  { %4519 = vmatmul.mubr.msk.f32.vlgmr.msra.gmra.mrb[30].mxu1 %vm240_vm6, %v3016_v17  ;;  %v3904_v17 = vld [vmem:[%s5500_s20] sm:$0xff] }
0x1514   :  { %v4738_v51 = vpop.eup %4737  ;;  %4527 = vmatpush3.xpose.msk.msra.mxu1 %vm240_vm6, %v3250_v16  ;;  %4528 = vmatprep.mubr.msk.f32.mxu1 %vm4780_vm5, %v4779_v46 }
0x1515   :  { %v3015_v18 = vmul.f32 %v4738_v51, %v4734_v24  ;;  %4536 = vmatprep.subr.mxu1 %v4779_v46  ;;  %v3905_v51 = vld [vmem:[%s5500_s20 + $0x8] sm:$0xff] }
0x1517   :  { %4514 = vmatmul.mubr.msk.f32.vlgmr.msra.gmra.mrb[30].mxu0 %vm240_vm6, %v3015_v18  ;;  %4529 = vmatmul.mubr.msk.f32.vlgmr.msra.gmra.mrb[32].mxu1 %vm240_vm6, %v3248_v29  ;;  %v3906_v18 = vld [vmem:[%s5500_s20 + $0x10] sm:$0xff]  ;;  %v4615_v29 = vpack.c.bf16 %v3905_v51, %v3904_v17 }
0x1518   :  { %4522 = vmatpush3.xpose.msk.msra.mxu0 %vm240_vm6, %v3172_v14  ;;  %4523 = vmatprep.mubr.msk.f32.mxu0 %vm4780_vm5, %v4779_v46 }
0x1519   :  { %4531 = vmatprep.subr.mxu0 %v4779_v46  ;;  %4538 = vmatprep.mubr.msk.f32.mxu1 %vm4780_vm5, %v4779_v46 }
0x151b   :  { %4524 = vmatmul.mubr.msk.f32.vlgmr.msra.gmra.mrb[32].mxu0 %vm240_vm6, %v3170_v19  ;;  %v3907_v19 = vld [vmem:[%s5500_s20 + $0x18] sm:$0xff] }
0x151c   :  { %4533 = vmatprep.mubr.msk.f32.mxu0 %vm4780_vm5, %v4779_v46 }
0x15e6   :  { %v3165_v27 = vpop.f32.mrb[30].mxu1 }
0x15e7   :  { %v4520_v5 = vpop.f32.mrb[31].mxu1 }
0x15e8   :  { %v3998_v5 = vld [vmem:[%s5502_s22] sm:$0xff] }
0x15ea   :  { %v3089_v7 = vpop.f32.mrb[30].mxu0  ;;  %v3321_v20 = vpop.f32.mrb[32].mxu1 }
0x15eb   :  { %v3326_v26 = vmul.f32 0.35355338, %v3321_v20  ;;  %v4515_v22 = vpop.f32.mrb[31].mxu0  ;;  %v4530_v30 = vpop.f32.mrb[33].mxu1 }
0x15ed   :  { %v3328_v32 = vadd.f32 %v5238_v31, %v3326_v26 }
0x15ee   :  { %v3243_v33 = vpop.f32.mrb[32].mxu0 }
0x15ef   :  { %v3325_v34 = vmul.f32 0.35355338, %v3243_v33  ;;  %v4525_v1 = vpop.f32.mrb[33].mxu0  ;;  %v3332_v36 = vsel %vm240_vm6, %v3328_v32, -inf }
0x15f0   :  { %3333 = vmax.xlane.f32.xlu1 %v3332_v36 }
0x15f1   :  { %v3327_v37 = vadd.f32 %v5243_v35, %v3325_v34 }
0x15f3   :  { %v3329_v0 = vsel %vm240_vm6, %v3327_v37, -inf }
0x15f4   :  { %3330 = vmax.xlane.f32.xlu0 %v3329_v0 }
0x1601   :  { %3427 = vrot.lane.b32.xlu1 %v5213_v21, %s4789_s29 }
0x167d   :  { %v3334_v46 = vpop.xlane.xlu1 %3333 }
0x167e   :  { %v3336_v38 = vsub.f32 %v3328_v32, %v3334_v46 }
0x1680   :  { %v3339_v39 = vmul.f32 1.442695, %v3336_v38 }
0x1681   :  { %v3428_v40 = vpop.permute.xlu1 %3427  ;;  %v3331_v41 = vpop.xlane.xlu0 %3330 }
0x1682   :  { %4739 = vpow2.f32 %v3339_v39  ;;  %v3335_v31 = vsub.f32 %v3327_v37, %v3331_v41  ;;  %4537 = vmatpush3.msra.mxu1 %v3428_v40 }
0x1683   :  { %4616 = vmatprep.subr.bf16.mxu1 %v4615_v29 }
0x1684   :  { %v3337_v42 = vmul.f32 1.442695, %v3335_v31 }
0x1686   :  { %4741 = vpow2.f32 %v3337_v42  ;;  %v4198_v42 = vld [vmem:[%s5498_s18] ss:$0 sm:$0xff] }
0x168c   :  { %v4740_v44 = vpop.eup %4739 }
0x168d   :  { %v3344_v47 = vsel %vm240_vm6, %v4740_v44, 0.0 }
0x168e   :  { %3345 = vadd.xlane.f32.xlu0 %v3344_v47 }
0x1690   :  { %v4742_v35 = vpop.eup %4741 }
0x1691   :  { %v3341_v48 = vsel %vm240_vm6, %v4742_v35, 0.0 }
0x1692   :  { %3342 = vadd.xlane.f32.xlu0 %v3341_v48 }
0x16a8   :  { %3351 = vrot.lane.b32.xlu0 %v5215_v23, %s4789_s29  ;;  %v3503_v23 = vld [vmem:[%s5496_s16] sm:$0xff] }
0x171b   :  { %v3346_v21 = vpop.xlane.xlu0 %3345 }
0x171c   :  { %4743 = vrcp.f32 %v3346_v21  ;;  %v4199_v21 = vld [vmem:[%s5499_s19] ss:$0 sm:$0xff] }
0x171f   :  { %v3343_v50 = vpop.xlane.xlu0 %3342 }
0x1720   :  { %4745 = vrcp.f32 %v3343_v50 }
0x1723   :  { %v3352_v53 = vpop.permute.xlu0 %3351 }
0x1724   :  { %4532 = vmatpush3.msra.mxu0 %v3352_v53  ;;  %v4000_v53 = vld [vmem:[%s5502_s22 + $0x10] sm:$0xff] }
0x1725   :  { %4541 = vmatprep.subr.mxu0 %v3504_v52 }
0x1726   :  { %v4744_v54 = vpop.eup %4743 }
0x1727   :  { %v3350_v56 = vmul.f32 %v4744_v54, %v4740_v44  ;;  %v4001_v54 = vld [vmem:[%s5502_s22 + $0x18] sm:$0xff] }
0x1729   :  { %4539 = vmatmul.mubr.msk.f32.vlgmr.msra.gmra.mrb[34].mxu1 %vm240_vm6, %v3350_v56 }
0x172a   :  { %v4746_v57 = vpop.eup %4745  ;;  %4618 = vmatpush3.bf16.msra.mxu1 %v4615_v29 }
0x172b   :  { %v3349_v58 = vmul.f32 %v4746_v57, %v4742_v35 }
0x172d   :  { %4534 = vmatmul.mubr.msk.f32.vlgmr.msra.gmra.mrb[34].mxu0 %vm240_vm6, %v3349_v58  ;;  %v4627_v58 = vpack.c.bf16 %v4001_v54, %v4000_v53 }
0x172e   :  { %4543 = vmatprep.mubr.msk.f32.mxu0 %vm240_vm6, %v5323_v45  ;;  %4542 = vmatpush3.msra.mxu0 %v3504_v52 }
0x172f   :  { %4546 = vmatprep.subr.mxu0 %v3503_v23 }
0x1731   :  { %4544 = vmatmul.mubr.msk.f32.vlgmr.msra.gmra.mrb[36].mxu0 %vm240_vm6, %v5321_v43 }
0x1732   :  { %4548 = vmatprep.mubr.msk.f32.mxu0 %vm240_vm6, %v5283_v6  ;;  %4547 = vmatpush3.msra.mxu0 %v3503_v23  ;;  %v4002_v23 = vld [vmem:[%s5502_s22 + $0x20] sm:$0xff] }
0x1733   :  { %4551 = vmatprep.subr.mxu0 %v3505_v60 }
0x1739   :  { %4549 = vmatmul.mubr.msk.f32.vlgmr.msra.gmra.mrb[36].mxu0 %vm240_vm6, %v5281_v55 }
0x173a   :  { %4553 = vmatprep.mubr.msk.f32.mxu0 %vm240_vm6, %v3089_v7  ;;  %4552 = vmatpush3.msra.mxu0 %v3505_v60  ;;  %v3999_v7 = vld [vmem:[%s5502_s22 + $0x8] sm:$0xff] }
0x173b   :  { %4556 = vmatprep.subr.mxu0 %v3506_v61  ;;  %v4623_v20 = vpack.c.bf16 %v3999_v7, %v3998_v5  ;;  %v4003_v60 = vld [vmem:[%s5502_s22 + $0x28] sm:$0xff] }
0x1741   :  { %4554 = vmatmul.mubr.msk.f32.vlgmr.msra.gmra.mrb[36].mxu0 %vm240_vm6, %v3165_v27  ;;  %v4619_v27 = vpack.c.bf16 %v3907_v19, %v3906_v18 }
0x1742   :  { %4557 = vmatpush3.msra.mxu0 %v3506_v61  ;;  %v4631_v61 = vpack.c.bf16 %v4003_v60, %v4002_v23 }
0x1743   :  { %4620 = vmatprep.subr.bf16.mxu1 %v4619_v27 }
0x1744   :  { %4622 = vmatpush3.bf16.msra.mxu1 %v4619_v27 }
0x1745   :  { %4624 = vmatprep.subr.bf16.mxu1 %v4623_v20 }
0x17fc   :  { %v3499_v43 = vpop.f32.mrb[34].mxu1 }
0x17fd   :  { %v4540_v45 = vpop.f32.mrb[35].mxu1 }
0x17fe   :  { %v4005_v45 = vld [vmem:[%s5502_s22 + $0x38] sm:$0xff] }
0x1800   :  { %v3423_v62 = vpop.f32.mrb[34].mxu0 }
0x1801   :  { %v4535_v6 = vpop.f32.mrb[35].mxu0  ;;  %4558 = vmatprep.mubr.msk.f32.mxu0 %vm240_vm6, %v3423_v62 }
0x1802   :  { %4559 = vmatmul.mubr.msk.f32.vlgmr.msra.gmra.mrb[36].mxu0 %vm240_vm6, %v3499_v43  ;;  %v4004_v43 = vld [vmem:[%s5502_s22 + $0x30] sm:$0xff]  ;;  %v4200_v6 = vld [vmem:[%s5501_s21] ss:$0 sm:$0xff]  ;;  %s4792_s22 = smov [#allocation2]  }
0x1803   :  { %v4635_v62 = vpack.c.bf16 %v4005_v45, %v4004_v43  ;;  %s4106_s14 = sshll.u32 %s4792_s22, 4  ;;  %s4107_s14 = int_to_ptr.vmem [resolvable:$true] %s4106_s14 }
0x1804   :  { %s4755_s21 = scalar_lea.vmem %s4107_s14, 256  ;;  %p4760_p1 = scmp.lt.s32.totalorder %s4107_s14, %s4107_s14 }
0x1805   :  { %p4756_p0 = scmp.ne.s32.totalorder %s4107_s14, %s4755_s21  ;;  %p4761_p2 = scmp.lt.s32.totalorder %s4755_s21, %s4755_s21 }
0x1807   :  { %p4762_p3 = por %p4761_p2, %p4760_p1 }
0x1809   :  { %p4763_p4 = pnand %p4762_p3, %p4756_p0 }
0x18d5   :  { %v4560_v55 = vpop.f32.mrb[36].mxu0 }
0x18d6   :  { %v3843_v2 = vadd.f32 %v4560_v55, %v4197_v63  ;;  %v3825_v3 = vpop.f32.mrb[37].mxu0 }
0x18d7   :  { %v3842_v4 = vadd.f32 %v4197_v63, %v3825_v3 }
0x18d8   :  { %v5401_v8 = vadd.f32 %v3843_v2, %v5151_v25 }
0x18d9   :  { %v5404_v9 = vadd.f32 %v3842_v4, %v5154_v28 }
0x18da   :  { %v3851_v59 = vsel %vm84_vm0, %v5401_v8, 0.0 }
0x18db   :  { %3852 = vadd.xlane.f32.xlu0 %v3851_v59  ;;  %v3848_v10 = vsel %vm84_vm0, %v5404_v9, 0.0 }
0x18dc   :  { %3849 = vadd.xlane.f32.xlu1 %v3848_v10 }
0x1968   :  { %v3853_v49 = vpop.xlane.xlu0 %3852 }
0x1969   :  { %v3855_v24 = vmul.f32 0.03125, %v3853_v49  ;;  %v3850_v11 = vpop.xlane.xlu1 %3849  ;;  %v4205_v49 = vld [vmem:[%s5503_s23] ss:$0 sm:$0xff] }
0x196a   :  { %v3854_v12 = vmul.f32 0.03125, %v3850_v11 }
0x196b   :  { %v3857_v13 = vsub.f32 %v5401_v8, %v3855_v24 }
0x196c   :  { %v3856_v25 = vsub.f32 %v5404_v9, %v3854_v12 }
0x196d   :  { %v3859_v14 = vmul.f32 %v3857_v13, %v3857_v13  ;;  %v3893_v44 = vmul.f32 %v4198_v42, %v3857_v13 }
0x196e   :  { %v3858_v15 = vmul.f32 %v3856_v25, %v3856_v25  ;;  %v3892_v35 = vmul.f32 %v4198_v42, %v3856_v25 }
0x196f   :  { %v3863_v28 = vsel %vm84_vm0, %v3859_v14, 0.0 }
0x1970   :  { %3864 = vadd.xlane.f32.xlu1 %v3863_v28  ;;  %v3860_v16 = vsel %vm84_vm0, %v3858_v15, 0.0 }
0x1971   :  { %3861 = vadd.xlane.f32.xlu0 %v3860_v16 }
0x19fd   :  { %v3865_v26 = vpop.xlane.xlu1 %3864 }
0x19fe   :  { %v3867_v22 = vmul.f32 0.032258064, %v3865_v26  ;;  %v3862_v30 = vpop.xlane.xlu0 %3861 }
0x19ff   :  { %v3866_v32 = vmul.f32 0.032258064, %v3862_v30 }
0x1a00   :  { %4747 = vrsqrt.f32 %v3867_v22  ;;  %vm3877_vm11 = vcmp.eq.f32.partialorder %v3867_v22, inf  ;;  %v3880_v36 = vand.u32 2147483648, %v3867_v22  ;;  %vm3879_vm12 = vcmp.eq.f32.partialorder %v3867_v22, 0.0 }
0x1a01   :  { %4749 = vrsqrt.f32 %v3866_v32  ;;  %vm3870_vm13 = vcmp.eq.f32.partialorder %v3866_v32, inf  ;;  %v3873_v46 = vand.u32 2147483648, %v3866_v32  ;;  %vm3872_vm14 = vcmp.eq.f32.partialorder %v3866_v32, 0.0 }
0x1a0a   :  { %v4748_v33 = vpop.eup %4747 }
0x1a0b   :  { %v4750_v34 = vpop.eup %4749  ;;  %v3876_v1 = vmul.f32 %v4748_v33, %v3867_v22 }
0x1a0c   :  { %v3869_v37 = vmul.f32 %v4750_v34, %v3866_v32 }
0x1a0d   :  { %v3878_v0 = vsel %vm3877_vm11, %v3867_v22, %v3876_v1 }
0x1a0e   :  { %v3881_v38 = vsel %vm3879_vm12, %v3880_v36, %v3878_v0  ;;  %v3871_v39 = vsel %vm3870_vm13, %v3866_v32, %v3869_v37 }
0x1a0f   :  { %v3883_v40 = vadd.f32 1e-06, %v3881_v38  ;;  %v3874_v41 = vsel %vm3872_vm14, %v3873_v46, %v3871_v39 }
0x1a10   :  { %v3882_v31 = vadd.f32 1e-06, %v3874_v41 }
0x1a11   :  { %4751 = vrcp.f32 %v3883_v40 }
0x1a12   :  { %4753 = vrcp.f32 %v3882_v31 }
0x1a1b   :  { %v4752_v47 = vpop.eup %4751 }
0x1a1c   :  { %v4754_v48 = vpop.eup %4753  ;;  %v3895_v50 = vmul.f32 %v4752_v47, %v3893_v44 }
0x1a1d   :  { %v3894_v52 = vmul.f32 %v4754_v48, %v3892_v35 }
0x1a1e   :  { %v3903_v57 = vadd.f32 %v4199_v21, %v3895_v50 }
0x1a1f   :  { %v3902_v56 = vadd.f32 %v4199_v21, %v3894_v52 }
0x1a21   :  { %4569 = vmatprep.mubr.msk.f32.mxu1 %vm84_vm0, %v3902_v56 }
0x1a22   :  { %4570 = vmatmul.mubr.msk.f32.vlgmr.msra.gmra.mrb[36].mxu1 %vm84_vm0, %v3903_v57 }
0x1a23   :  { %4626 = vmatpush3.bf16.msra.mxu1 %v4623_v20 }
0x1a24   :  { %4628 = vmatprep.subr.bf16.mxu1 %v4627_v58 }
0x1a27   :  { %4630 = vmatpush3.bf16.msra.mxu1 %v4627_v58 }
0x1a28   :  { %4632 = vmatprep.subr.bf16.mxu1 %v4631_v61 }
0x1a2b   :  { %4634 = vmatpush3.bf16.msra.mxu1 %v4631_v61 }
0x1a2c   :  { %4636 = vmatprep.subr.bf16.mxu1 %v4635_v62 }
0x1a2f   :  { %4638 = vmatpush3.bf16.msra.mxu1 %v4635_v62 }
0x1af5   :  { %v4571_v63 = vpop.f32.mrb[36].mxu1 }
0x1af6   :  { %v3993_v55 = vadd.f32 %v4571_v63, %v4200_v6  ;;  %v3987_v2 = vpop.f32.mrb[37].mxu1 }
0x1af7   :  { %v3988_v3 = vadd.f32 %v4200_v6, %v3987_v2 }
0x1af8   :  { %v3997_v59 = vmax.f32 %v3993_v55, 0.0 }
0x1af9   :  { %v3996_v4 = vmax.f32 %v3988_v3, 0.0 }
0x1afb   :  { %4588 = vmatprep.mubr.msk.f32.mxu1 %vm4006_vm15, %v3996_v4 }
0x1afc   :  { %4589 = vmatmul.mubr.msk.f32.vlgmr.msra.gmra.mrb[38].mxu1 %vm4006_vm15, %v3997_v59 }
0x1bcf   :  { %v4590_v10 = vpop.f32.mrb[38].mxu1 }
0x1bd0   :  { %v4089_v24 = vadd.f32 %v4590_v10, %v5401_v8  ;;  %v4079_v11 = vpop.f32.mrb[39].mxu1 }
0x1bd1   :  { %v4088_v12 = vadd.f32 %v4079_v11, %v5404_v9 }
0x1bd2   :  { %v4098_v13 = vadd.f32 %v4205_v49, %v4089_v24 }
0x1bd3   :  { %v4097_v25 = vadd.f32 %v4205_v49, %v4088_v12 }
0x1bd4   :  { %4100 = vst.msk [vmem:[#allocation2 + $0x8] sm:$0xff] %vm84_vm0, %v4098_v13 }
0x1bd5   :  { %4099 = vst.msk [vmem:[#allocation2] sm:$0xff] %vm84_vm0, %v4097_v25 }
0x1bd6   :  { %4766 = shalt.err (!%p4763_p4)
}
0x1bd7   :  { %s4767_s2 = scalar_lea.hbm %s5504_s24, 256 }
0x1bd8   :  { %p4768_p5 = scmp.ne.s32.totalorder %s5504_s24, %s4767_s2  ;;  %p4771_p6 = scmp.lt.u32.totalorder %s4767_s2, %s5504_s24 }
0x1bda   :  { %p4773_p7 = pnand %p4771_p6, %p4768_p5 }
0x1bdc   :  { %4776 = shalt.err (!%p4773_p7)
}
0x1bdd   :  { %s4793_s20 = smov 128   ;;  %s4794_s25 = smov 8  }
0x1bde   :  { %4112 = dma.vmem_to_hbm [thread:$0]  %s4107_s14, 256, %s5504_s24, [#allocation3], %s4793_s20, %s4793_s20, %s4794_s25  }
0x1bdf   :  { %4777 = dma.done.wait [#allocation3], 256  }
0x1be0   :  { %4778 = vsyncadd [#allocation3], 4294967040 }
0x1be1   :  { %4116 = vsyncpa [#allocation3], 1 }

</bundles_post_ra>
